<compile_context>
chip_gen: v7x
topology: tpu7x:2x2x1
jax: 0.10.0
libtpu: 0.0.40
codegen_flags: <defaults>
</compile_context>

<pallas_src>
import jax
import jax.numpy as jnp
import numpy as np
from jax.experimental import pallas as pl
from jax.experimental.pallas import tpu as pltpu

BLOCK_M = 128  # sparsity granularity along the token/row axis (full MXU height)


def _sparse_mlp_kernel(mask_ref, x_ref, w1_ref, w2_ref, o_ref, acc_ref):
    # mask_ref: SMEM scalar-prefetch, per-row-block nonzero flag        (int32)
    # x_ref:    (BLOCK_M, E)   row block i of x                          (bf16)
    # w1_ref:   (E, tile_h)    fc1 weight slice for hidden tile h        (bf16)
    # w2_ref:   (tile_h, O)    fc2 weight slice for hidden tile h        (bf16)
    # o_ref:    (BLOCK_M, O)   output row block i
    # acc_ref:  (BLOCK_M, O)   f32 accumulator across the hidden (h) axis
    i = pl.program_id(0)
    h = pl.program_id(1)
    is_nz = mask_ref[i] != 0

    @pl.when(h == 0)
    def _init():
        acc_ref[...] = jnp.zeros_like(acc_ref)

    @pl.when(is_nz)
    def _compute():
        # fc1 slice: hidden activation tile lives only in VMEM/vregs.
        h_tile = jnp.dot(x_ref[...], w1_ref[...],
                         preferred_element_type=jnp.float32)
        # fc2 partial product, accumulated in f32 over the hidden axis.
        acc_ref[...] += jnp.dot(h_tile.astype(w2_ref.dtype), w2_ref[...],
                                preferred_element_type=jnp.float32)

    @pl.when(h == pl.num_programs(1) - 1)
    def _finalize():
        # Zero blocks never touched acc -> it is still the zero init.
        o_ref[...] = acc_ref[...].astype(o_ref.dtype)


def _vmem_capacity_bytes():
    try:
        info = pltpu.get_tpu_info()
        cap = getattr(info, "vmem_capacity_bytes", None)
        if cap:
            return int(cap)
    except Exception:
        pass
    return 64 * 1024 * 1024  # conservative default (v7x per-TC VMEM)


def _auto_tile_h(E, H, O, dtype_bytes, vmem_budget):
    """Largest hidden-tile width (multiple of 128 dividing H) fitting the budget."""
    def footprint(th):
        # Conservatively count double-buffered inputs/outputs + f32 accumulator.
        x_b = 2 * BLOCK_M * E * dtype_bytes
        w1_b = 2 * E * th * dtype_bytes
        w2_b = 2 * th * O * dtype_bytes
        out_b = 2 * BLOCK_M * O * dtype_bytes
        acc_b = BLOCK_M * O * 4
        return x_b + w1_b + w2_b + out_b + acc_b

    candidates = [H] + [t for t in range(H - 128, 0, -128) if H % t == 0]
    for th in candidates:
        if footprint(th) <= vmem_budget:
            return th
    return 128  # floor; see TODO(synk) about weight-stationary ordering


def sparse_mlp_fused(x, w1, w2, nz_block_indices, num_nz_blocks, *, tile_h=None):
    """Fused row-block-sparse MLP: out = sparse(x) @ W1 @ W2.

    Only the 128-row blocks listed in nz_block_indices[:num_nz_blocks] are
    computed; every other row block of the output is written as zeros.
    num_nz_blocks may be dynamic (it only gates the mask construction).
    """
    S, E = x.shape
    E2, H = w1.shape
    H2, O = w2.shape
    assert E == E2 and H == H2
    assert S % BLOCK_M == 0
    assert H % 128 == 0 and O % 128 == 0
    num_row_blocks = S // BLOCK_M

    dtype_bytes = jnp.dtype(x.dtype).itemsize
    vmem_cap = _vmem_capacity_bytes()
    if tile_h is None:
        tile_h = _auto_tile_h(E, H, O, dtype_bytes, int(vmem_cap * 0.55))
    assert H % tile_h == 0 and tile_h % 128 == 0
    n_h = H // tile_h

    # Per-row-block nonzero mask (handles dynamic num_nz_blocks, duplicate
    # indices, and num_nz_blocks == 0).
    valid = (jnp.arange(nz_block_indices.shape[0]) < num_nz_blocks).astype(jnp.int32)
    mask = jnp.zeros((num_row_blocks,), jnp.int32).at[nz_block_indices].max(valid)

    grid_spec = pltpu.PrefetchScalarGridSpec(
        num_scalar_prefetch=1,                       # nonzero mask -> SMEM
        grid=(num_row_blocks, n_h),                  # (row block, hidden tile)
        in_specs=[
            pl.BlockSpec((BLOCK_M, E), lambda i, h, m: (i, 0)),
            # fc1 weight slice; constant index when n_h == 1 -> VMEM-resident.
            pl.BlockSpec((E, tile_h), lambda i, h, m: (0, h)),
            # fc2 weight slice, full output width (lane-dense unmasked stores).
            pl.BlockSpec((tile_h, O), lambda i, h, m: (h, 0)),
        ],
        out_specs=pl.BlockSpec((BLOCK_M, O), lambda i, h, m: (i, 0)),
        scratch_shapes=[pltpu.VMEM((BLOCK_M, O), jnp.float32)],
    )

    return pl.pallas_call(
        _sparse_mlp_kernel,
        out_shape=jax.ShapeDtypeStruct((S, O), x.dtype),
        grid_spec=grid_spec,
        compiler_params=pltpu.CompilerParams(
            # Row blocks write disjoint output tiles -> parallel (v7x megacore);
            # hidden axis is the reduction.
            dimension_semantics=("parallel", "arbitrary"),
            # Generation-aware scoped-VMEM budget (stays under v7x's 64 MiB).
            vmem_limit_bytes=int(vmem_cap * 0.75),
        ),
    )(mask, x, w1, w2)


class SparseMLP:
    """JAX/Pallas port of the PyTorch SparseMLP (fc1 -> fc2, no bias/activation)."""

    def __init__(self, embed_dim, hidden_dim, output_dim, key, dtype=jnp.bfloat16):
        k1, k2 = jax.random.split(key)
        self.fc1_weight = jax.random.normal(
            k1, (embed_dim, hidden_dim), jnp.float32).astype(dtype)
        self.fc2_weight = jax.random.normal(
            k2, (hidden_dim, output_dim), jnp.float32).astype(dtype)

    def __call__(self, x, nz_block_indices, num_nz_blocks):
        return sparse_mlp_fused(x, self.fc1_weight, self.fc2_weight,
                                nz_block_indices, num_nz_blocks)


if __name__ == "__main__":
    key = jax.random.PRNGKey(0)
    kx, kp = jax.random.split(key)

    # Small, lane-dense shapes: 512 tokens (4 row blocks of 128), E=256, H=512, O=256.
    S, E, H, O = 512, 256, 512, 256
    x = jax.random.normal(kx, (S, E), jnp.float32).astype(jnp.bfloat16)

    NZ_BLOCK_INDICES = jnp.array([3, 1], dtype=jnp.int32)
    NUM_NZ_BLOCKS = 2

    mlp = SparseMLP(E, H, O, kp)

    # Path 1: auto tile_h (weights fully VMEM-resident, single hidden pass).
    y = mlp(x, NZ_BLOCK_INDICES, NUM_NZ_BLOCKS)
    # Path 2: forced hidden tiling (exercises the H-reduction / accumulator path).
    y_tiled = sparse_mlp_fused(x, mlp.fc1_weight, mlp.fc2_weight,
                               NZ_BLOCK_INDICES, NUM_NZ_BLOCKS, tile_h=128)
    jax.block_until_ready((y, y_tiled))

    # Pure-JAX reference: same bf16 inputs / f32 accumulation, zeros elsewhere.
    rows = (NZ_BLOCK_INDICES[:NUM_NZ_BLOCKS, None] * BLOCK_M
            + jnp.arange(BLOCK_M)[None, :]).reshape(-1)
    h_nz = jnp.dot(x[rows], mlp.fc1_weight,
                   preferred_element_type=jnp.float32).astype(jnp.bfloat16)
    y_nz = jnp.dot(h_nz, mlp.fc2_weight,
                   preferred_element_type=jnp.float32).astype(jnp.bfloat16)
    y_ref = jnp.zeros((S, O), jnp.bfloat16).at[rows].set(y_nz)

    np.testing.assert_allclose(np.asarray(y, np.float32),
                               np.asarray(y_ref, np.float32),
                               rtol=2e-2, atol=2e-1)
    np.testing.assert_allclose(np.asarray(y_tiled, np.float32),
                               np.asarray(y_ref, np.float32),
                               rtol=2e-2, atol=2e-1)
    print("KERNEL_OK")
</pallas_src>

<mosaic_0001>
module attributes {stable_mosaic.version = 11 : i64} {
  func.func @_sparse_mlp_kernel(%arg0: i32, %arg1: i32, %arg2: memref<4xi32, #tpu.memory_space<smem>>, %arg3: memref<128x256xbf16, #tpu.memory_space<vmem>>, %arg4: memref<256x512xbf16, #tpu.memory_space<vmem>>, %arg5: memref<512x256xbf16, #tpu.memory_space<vmem>>, %arg6: memref<128x256xbf16, #tpu.memory_space<vmem>>, %arg7: memref<128x256xf32, #tpu.memory_space<vmem>>) attributes {dimension_semantics = [#tpu.dimension_semantics<parallel>, #tpu.dimension_semantics<arbitrary>], iteration_bounds = array<i64: 4, 1>, scalar_prefetch = 1 : i64, scratch_operands = 1 : i64, tpu.core_type = #tpu.core_type<tc>, window_params = [{transform_indices = @transform_0, window_bounds = array<i64: 128, 256>}, {transform_indices = @transform_1, window_bounds = array<i64: 256, 512>}, {transform_indices = @transform_2, window_bounds = array<i64: 512, 256>}, {transform_indices = @transform_3, window_bounds = array<i64: 128, 256>}]} {
    %0 = arith.index_cast %arg0 : i32 to index
    %1 = memref.load %arg2[%0] : memref<4xi32, #tpu.memory_space<smem>>
    %c0_i32 = arith.constant 0 : i32
    %2 = arith.cmpi ne, %1, %c0_i32 : i32
    %c0_i32_0 = arith.constant 0 : i32
    %3 = arith.cmpi eq, %arg1, %c0_i32_0 : i32
    %4 = arith.extui %3 : i1 to i32
    %c0_i32_1 = arith.constant 0 : i32
    %5 = arith.cmpi ne, %4, %c0_i32_1 : i32
    scf.if %5 {
      %cst = arith.constant 0.000000e+00 : f32
      %11 = vector.broadcast %cst : f32 to vector<128x256xf32>
      %c0 = arith.constant 0 : index
      %c0_5 = arith.constant 0 : index
      %12 = vector.load %arg7[%c0, %c0_5] : memref<128x256xf32, #tpu.memory_space<vmem>>, vector<128x256xf32>
      tpu.vector_store %arg7[%c0, %c0_5], %11 {strides = array<i32>} : memref<128x256xf32, #tpu.memory_space<vmem>>, vector<128x256xf32>,
    } else {
    }
    %6 = arith.extui %2 : i1 to i32
    %c0_i32_2 = arith.constant 0 : i32
    %7 = arith.cmpi ne, %6, %c0_i32_2 : i32
    scf.if %7 {
      %c0 = arith.constant 0 : index
      %c0_5 = arith.constant 0 : index
      %11 = vector.load %arg3[%c0, %c0_5] : memref<128x256xbf16, #tpu.memory_space<vmem>>, vector<128x256xbf16>
      %c0_6 = arith.constant 0 : index
      %c0_7 = arith.constant 0 : index
      %12 = vector.load %arg4[%c0_6, %c0_7] : memref<256x512xbf16, #tpu.memory_space<vmem>>, vector<256x512xbf16>
      %cst = arith.constant dense<0.000000e+00> : vector<128x512xf32>
      %13 = tpu.matmul %11, %12, %cst {dimension_numbers = #tpu.dot_dimension_numbers<[1], [0], [0], [1], [0, 0, 1, 1], [], []>} : vector<128x256xbf16>, vector<256x512xbf16>, vector<128x512xf32> -> vector<128x512xf32>
      %c0_8 = arith.constant 0 : index
      %c0_9 = arith.constant 0 : index
      %14 = vector.load %arg7[%c0_8, %c0_9] : memref<128x256xf32, #tpu.memory_space<vmem>>, vector<128x256xf32>
      %15 = arith.truncf %13 : vector<128x512xf32> to vector<128x512xbf16>
      %c0_10 = arith.constant 0 : index
      %c0_11 = arith.constant 0 : index
      %16 = vector.load %arg5[%c0_10, %c0_11] : memref<512x256xbf16, #tpu.memory_space<vmem>>, vector<512x256xbf16>
      %cst_12 = arith.constant dense<0.000000e+00> : vector<128x256xf32>
      %17 = tpu.matmul %15, %16, %cst_12 {dimension_numbers = #tpu.dot_dimension_numbers<[1], [0], [0], [1], [0, 0, 1, 1], [], []>} : vector<128x512xbf16>, vector<512x256xbf16>, vector<128x256xf32> -> vector<128x256xf32>
      %18 = arith.addf %14, %17 : vector<128x256xf32>
      %c0_13 = arith.constant 0 : index
      %c0_14 = arith.constant 0 : index
      %19 = vector.load %arg7[%c0_13, %c0_14] : memref<128x256xf32, #tpu.memory_space<vmem>>, vector<128x256xf32>
      tpu.vector_store %arg7[%c0_13, %c0_14], %18 {strides = array<i32>} : memref<128x256xf32, #tpu.memory_space<vmem>>, vector<128x256xf32>,
    } else {
    }
    %c0_i32_3 = arith.constant 0 : i32
    %8 = arith.cmpi eq, %arg1, %c0_i32_3 : i32
    %9 = arith.extui %8 : i1 to i32
    %c0_i32_4 = arith.constant 0 : i32
    %10 = arith.cmpi ne, %9, %c0_i32_4 : i32
    scf.if %10 {
      %c0 = arith.constant 0 : index
      %c0_5 = arith.constant 0 : index
      %11 = vector.load %arg7[%c0, %c0_5] : memref<128x256xf32, #tpu.memory_space<vmem>>, vector<128x256xf32>
      %12 = arith.truncf %11 : vector<128x256xf32> to vector<128x256xbf16>
      %c0_6 = arith.constant 0 : index
      %c0_7 = arith.constant 0 : index
      %13 = vector.load %arg6[%c0_6, %c0_7] : memref<128x256xbf16, #tpu.memory_space<vmem>>, vector<128x256xbf16>
      tpu.vector_store %arg6[%c0_6, %c0_7], %12 {strides = array<i32>} : memref<128x256xbf16, #tpu.memory_space<vmem>>, vector<128x256xbf16>,
    } else {
    }
    return
  }
  func.func @transform_0(%arg0: i32, %arg1: i32, %arg2: memref<4xi32, #tpu.memory_space<smem>>) -> (i32, i32) {
    %c0_i32 = arith.constant 0 : i32
    %c0_i32_0 = arith.constant 0 : i32
    return %arg0, %c0_i32 : i32, i32
  }
  func.func @transform_1(%arg0: i32, %arg1: i32, %arg2: memref<4xi32, #tpu.memory_space<smem>>) -> (i32, i32) {
    %c0_i32 = arith.constant 0 : i32
    %c0_i32_0 = arith.constant 0 : i32
    return %c0_i32, %arg1 : i32, i32
  }
  func.func @transform_2(%arg0: i32, %arg1: i32, %arg2: memref<4xi32, #tpu.memory_space<smem>>) -> (i32, i32) {
    %c0_i32 = arith.constant 0 : i32
    %c0_i32_0 = arith.constant 0 : i32
    return %arg1, %c0_i32 : i32, i32
  }
  func.func @transform_3(%arg0: i32, %arg1: i32, %arg2: memref<4xi32, #tpu.memory_space<smem>>) -> (i32, i32) {
    %c0_i32 = arith.constant 0 : i32
    %c0_i32_0 = arith.constant 0 : i32
    return %arg0, %c0_i32 : i32, i32
  }
}

</mosaic_0001>

<bundles_post_ra>
// kernel: tpu_custom_call.1
= control target key start
LH: loop header
LB: loop body
LE: loop exit
PB: predicated region body
PF: predicated region fallthrough
CT: control target
= control target key end

     0   :  { %s3129_s0 = inlined_call_operand.hbm [shape: s32[4], index: 0, kind: input, shape index: {}]   ;;  %s3130_s1 = inlined_call_operand.hbm [shape: bf16[512,256], index: 1, kind: input, shape index: {}]   ;;  %s3131_s2 = inlined_call_operand.hbm [shape: bf16[256,512], index: 2, kind: input, shape index: {}]   ;;  %s3132_s3 = inlined_call_operand.hbm [shape: bf16[512,256], index: 3, kind: input, shape index: {}]   ;;  %s3133_s4 = inlined_call_operand.hbm [shape: bf16[512,256], index: 4, kind: output, shape index: {}]  }
   0x1   :  { %s2549_s17 = scalar_lea.hbm %s3129_s0, 16 }
   0x2   :  { %p2550_p0 = scmp.ne.s32.totalorder %s3129_s0, %s2549_s17  ;;  %p2553_p1 = scmp.lt.u32.totalorder %s2549_s17, %s3129_s0 }
   0x4   :  { %p2555_p2 = pnand %p2553_p1, %p2550_p0 }
   0x6   :  { %2558 = shalt.err (!%p2555_p2)  }
   0x7   :  { %s2735_s22 = smov [#allocation4]  }
   0x8   :  { %10 = dma.hbm_to_smem %s3129_s0, 16, %s2735_s22, [#allocation3] }
   0x9   :  { %2697 = dma.done.wait [#allocation3], 16 }
   0xa   :  { %2698 = vsyncadd [#allocation3], 4294967280 }
   0xb   :  { %12 = sfence }
   0xc   :  { %13 = vsyncpa [#allocation6], 0 }
   0xd   :  { %15 = vsyncpa [#allocation6 + $0x1], 0 }
   0xe   :  { %16 = vsyncpa [#allocation9], 0 }
   0xf   :  { %17 = vsyncpa [#allocation7], 0 }
  0x10   :  { %19 = vsyncpa [#allocation7 + $0x1], 0  ;;  %s2784_s25 = smov 0   ;;  %s2786_s26 = smov 0  }
  0x11   :  { %s2788_s27 = smov 0   ;;  %s2790_s28 = smov 0  }
  0x12   :  { %s2792_s29 = smov 0   ;;  %s2794_s30 = smov 0  }
  0x13 LB: > { %s2008_s0 = sadd.s32 4294967295, %s2733_s30   ;;  %s2009_s5 = sadd.s32 4294967294, %s2733_s30   ;;  %s2733_s30 = sphi %s2794_s30, %s25_s30   ;;  %s2729_s29 = sphi %s2792_s29, %s3155_s29   ;;  %s2725_s28 = sphi %s2790_s28, %s3154_s28   ;;  %s2721_s27 = sphi %s2788_s27, %s3153_s27   ;;  %s2717_s26 = sphi %s2786_s26, %s3152_s26   ;;  %s2713_s25 = sphi %s2784_s25, %s3151_s25  }
  0x14   : > { %p57_p3 = scmp.ne.s32.totalorder %s2717_s26, %s2713_s25  ;;  %p2818_p4 = scmp.eq.s32.totalorder %s2008_s0, 0 }
  0x15   : > { %p2822_p5 = scmp.eq.s32.totalorder %s2008_s0, 3  ;;  %p139_p6 = scmp.eq.s32.totalorder %s2009_s5, 3 }
  0x16   : > { %s3138_s6 = scalar_select %p2818_p4, 1, 0 }
  0x17   : > { %s3139_s7 = scalar_select %p2822_p5, 1, 0 }
  0x18   : > { %p2828_p7 = por %p2818_p4, %p57_p3  ;;  %p2010_p8 = scmp.ge.s32.totalorder %s2733_s30, 1 }
  0x19   : > { %p2833_p9 = por %p139_p6, %p57_p3  ;;  %p146_p10 = scmp.lt.s32.totalorder %s2733_s30, 5 }
  0x1a   : > { %s3140_s8 = scalar_select %p2828_p7, 1, 0 }
  0x1b   : > { %s3141_s9 = scalar_select %p2833_p9, 1, 0 }
  0x1c   : > { %p2838_p11 = pnand %p2010_p8, %p146_p10  ;;  %s2736_s11 = smov [#allocation8]  }
  0x1d   : > { %s161_s12 = sshll.u32 %s2736_s11, 4  ;;  %s2737_s14 = smov [#allocation10]   ;;  %s162_s12 = int_to_ptr.vmem [resolvable:$true] %s161_s12 }
  0x1e   : > { %s3142_s10 = scalar_select %p2838_p11, 1, 0 }
  0x1f   : > { %p2254_p12 = pneg %p2838_p11  ;;  %s178_s15 = sshll.u32 %s2737_s14, 4  ;;  %s2850_s15 = int_to_ptr.vmem [resolvable:$true] %s178_s15 }
  0x20   : > { %s2559_s18 = scalar_lea.hbm %s3131_s2, 8192 }
  0x21   : > { %p2846_p13 = pnand %p2254_p12, %p2818_p4  ;;  %p2560_p0 = scmp.ne.s32.totalorder %s3131_s2, %s2559_s18 }
  0x22   : > { %p2566_p6 = scmp.lt.u32.totalorder %s2559_s18, %s3131_s2 }
  0x23   : > { %p2561_p1 = pneg %p2846_p13 }
  0x25   : > { %p2562_p2 = pnand %p2561_p1, %p2560_p0 }
  0x27   : > { %p2563_p3 = pneg %p2562_p2 }
  0x29   : > { %p2568_p8 = pnand %p2566_p6, %p2563_p3 }
  0x2b   : > { %2571 = shalt.err (!%p2568_p8)
}
  0x2c   : > { %s2572_s23 = scalar_lea.vmem %s162_s12, 8192  ;;  %p2580_p4 = scmp.lt.s32.totalorder %s162_s12, %s162_s12 }
  0x2d   : > { %p2573_p10 = scmp.ne.s32.totalorder %s162_s12, %s2572_s23  ;;  %p2581_p7 = scmp.lt.s32.totalorder %s2572_s23, %s2572_s23 }
  0x2f   : > { %p2575_p12 = pnand %p2573_p10, %p2561_p1  ;;  %p2582_p11 = por %p2581_p7, %p2580_p4 }
  0x31   : > { %p2576_p9 = pneg %p2575_p12 }
  0x33   : > { %p2583_p5 = pnand %p2582_p11, %p2576_p9 }
  0x35   : > { %2586 = shalt.err (!%p2583_p5)
}
  0x36   : > { %s2738_s24 = smov 256   ;;  %s2739_s0 = smov 16  }
  0x37   : > { %2257 = dma.hbm_to_vmem [thread:$0]  (!%p2846_p13), %s3131_s2, 8192, %s162_s12, [#allocation9], %s2738_s24, %s2738_s24, %s2739_s0  }
  0x38   : > { %s2587_s17 = scalar_lea.hbm %s3132_s3, 8192 }
  0x39   : > { %p2588_p0 = scmp.ne.s32.totalorder %s3132_s3, %s2587_s17  ;;  %p2594_p7 = scmp.lt.u32.totalorder %s2587_s17, %s3132_s3 }
  0x3b   : > { %p2590_p4 = pnand %p2588_p0, %p2561_p1 }
  0x3d   : > { %p2591_p5 = pneg %p2590_p4 }
  0x3f   : > { %p2596_p9 = pnand %p2594_p7, %p2591_p5 }
  0x41   : > { %2599 = shalt.err (!%p2596_p9)
}
  0x42   : > { %s2600_s12 = scalar_lea.vmem %s2850_s15, 8192  ;;  %p2608_p6 = scmp.lt.s32.totalorder %s2850_s15, %s2850_s15 }
  0x43   : > { %p2601_p11 = scmp.ne.s32.totalorder %s2850_s15, %s2600_s12  ;;  %p2609_p8 = scmp.lt.s32.totalorder %s2600_s12, %s2600_s12 }
  0x45   : > { %p2603_p2 = pnand %p2601_p11, %p2561_p1  ;;  %p2610_p10 = por %p2609_p8, %p2608_p6 }
  0x47   : > { %p2604_p3 = pneg %p2603_p2 }
  0x49   : > { %p2611_p12 = pnand %p2610_p10, %p2604_p3 }
  0x4b   : > { %2614 = shalt.err (!%p2611_p12)
}
  0x4c   : > { %s2740_s22 = smov 128   ;;  %s2741_s23 = smov 8  }
  0x4d   : > { %2260 = dma.hbm_to_vmem [thread:$0]  (!%p2846_p13), %s3132_s3, 8192, %s2850_s15, [#allocation9], %s2740_s22, %s2740_s22, %s2741_s23  }
  0x4e   : > { %s37_s5 = sadd.s32 1, %s2729_s29  ;;  %s44_s11 = sadd.s32 1, %s2721_s27 }
  0x4f   : > { %p39_p1 = scmp.ge.s32.totalorder %s37_s5, 4  ;;  %p51_p0 = scmp.ne.s32.totalorder %s2721_s27, %s2717_s26 }
  0x50   : > { %p52_p4 = scmp.eq.s32.totalorder %s2733_s30, 0  ;;  %p2271_p5 = scmp.lt.s32.totalorder %s2733_s30, 4 }
  0x51   : > { %s3157_s5 = smov (%p39_p1, %s37_s5), 0  ;;  %p3144_p9 = scmp.ne.s32.totalorder %s3139_s7, 0 }
  0x52   : > { %p53_p7 = por %p52_p4, %p51_p0  ;;  %s41_s14 = ssub.s32 %s2729_s29, %s3157_s5 }
  0x53   : > { %p2912_p11 = por %p3144_p9, %p51_p0  ;;  %s192_s16 = sand.u32 1, %s2721_s27  }
  0x54   : > { %p42_p2 = scmp.eq.s32.totalorder %s41_s14, 0  ;;  %s2014_s15 = sshll.u32 %s192_s16, 7 }
  0x55   : > { %s2191_s17 = sshll.u32 %s2729_s29, 11  ;;  %s196_s7 = scalar_lea.vmem [#allocation5], %s2014_s15 }
  0x56   : > { %s2921_s18 = scalar_select %p42_p2, %s2721_s27, %s44_s11  }
  0x57   : > { %s2926_s21 = scalar_lea.hbm %s3130_s1, %s2191_s17  ;;  %s204_s12 = sshll.u32 %s196_s7, 4  ;;  %s2934_s12 = int_to_ptr.vmem [resolvable:$true] %s204_s12 }
  0x58   : > { %p2930_p13 = pnand %p2271_p5, %p53_p7  ;;  %s2936_s0 = scalar_lea.sflag [#allocation6], %s192_s16 }
  0x59   : > { %s2615_s11 = scalar_lea.hbm %s2926_s21, 2048  ;;  %s2620_s17 = scalar_lea.hbm %s3130_s1, 8192 }
  0x5a   : > { %p2616_p3 = scmp.ne.s32.totalorder %s2926_s21, %s2615_s11  ;;  %p2617_p6 = pneg %p2930_p13 }
  0x5b   : > { %p2621_p12 = scmp.lt.u32.totalorder %s2926_s21, %s3130_s1  ;;  %p2622_p1 = scmp.lt.u32.totalorder %s2620_s17, %s2615_s11 }
  0x5c   : > { %p2618_p8 = pnand %p2617_p6, %p2616_p3  ;;  %p2624_p4 = scmp.lt.u32.totalorder %s2615_s11, %s2926_s21 }
  0x5d   : > { %p2623_p0 = por %p2622_p1, %p2621_p12 }
  0x5e   : > { %p2619_p10 = pneg %p2618_p8 }
  0x5f   : > { %p2625_p5 = por %p2624_p4, %p2623_p0 }
  0x61   : > { %p2626_p7 = pnand %p2625_p5, %p2619_p10 }
  0x63   : > { %2629 = shalt.err (!%p2626_p7)
}
  0x64   : > { %s2630_s16 = scalar_lea.vmem %s2934_s12, 2048  ;;  %s2742_s7 = smov [#allocation5]  }
  0x65   : > { %p2631_p9 = scmp.ne.s32.totalorder %s2934_s12, %s2630_s16  ;;  %s2635_s14 = sshll.u32 %s2742_s7, 4  ;;  %s2636_s14 = int_to_ptr.vmem [resolvable:$false] %s2635_s14 }
  0x66   : > { %s2637_s15 = scalar_lea.vmem %s2636_s14, 4096  ;;  %p2638_p8 = scmp.lt.s32.totalorder %s2934_s12, %s2636_s14 }
  0x67   : > { %p2633_p2 = pnand %p2631_p9, %p2617_p6  ;;  %p2639_p12 = scmp.lt.s32.totalorder %s2637_s15, %s2630_s16 }
  0x69   : > { %p2634_p3 = pneg %p2633_p2  ;;  %p2640_p1 = por %p2639_p12, %p2638_p8 }
  0x6b   : > { %p2641_p0 = pnand %p2640_p1, %p2634_p3 }
  0x6d   : > { %2644 = shalt.err (!%p2641_p0)
}
  0x6e   : > { %2264 = dma.hbm_to_vmem [thread:$0]  (!%p2930_p13), %s2926_s21, 2048, %s2934_s12, %s2936_s0, %s2740_s22, %s2740_s22, %s2741_s23  }
  0x6f   : > { %p3147_p6 = scmp.ne.s32.totalorder %s3142_s10, 0 }
  0x70   : > { %s2970_s11 = sand.u32 (!%p3147_p6), 1, %s2717_s26   ;;  %p3148_p10 = scmp.ne.s32.totalorder (!%p3147_p6), %s3140_s8, 0 }
  0x71   : > { %216 = sbr.rel (%p3147_p6) target bundleno = 781 (0x30d), region = 32  ;;  %s2019_s17 = sshll.u32 (!%p3147_p6), %s2970_s11, 7 }
  0x72   : > { %s219_s19 = scalar_lea.sflag (!%p3147_p6), [#allocation6], %s2970_s11  ;;  %s2976_s24 = scalar_lea.vmem (!%p3147_p6), [#allocation5], %s2019_s17 }
  0x78   : > { %2700 = dma.done.wait (%p3148_p10), %s219_s19, 2048  }
  0x79   : > { %2702 = vsyncadd (%p3148_p10), %s219_s19, 4294965248  ;;  %p3149_p13 = scmp.ne.s32.totalorder %s3138_s6, 0 }
  0x7b   : > { %2704 = dma.done.wait (%p3149_p13), [#allocation9], 16384  }
  0x7c   : > { %2706 = vsyncadd (%p3149_p13), [#allocation9], 4294950912  ;;  %s2987_s10 = sld [smem:[#allocation4 + %s2725_s28]]  ;;  %v2743_v0 = vmov 0.0   ;;  %s2991_s6 = scalar_lea.vmem [#allocation11], %s2019_s17 }
  0x7d   : > { %263 = vst [vmem:[#allocation2] sm:$0xff] %v2743_v0  ;;  %264 = vst [vmem:[#allocation2 + $0x8] sm:$0xff] %v2743_v0 }
  0x7e   : > { %265 = vst [vmem:[#allocation2 + $0x10] sm:$0xff] %v2743_v0  ;;  %266 = vst [vmem:[#allocation2 + $0x18] sm:$0xff] %v2743_v0 }
  0x7f   : > { %267 = vst [vmem:[#allocation2 + $0x20] sm:$0xff] %v2743_v0  ;;  %268 = vst [vmem:[#allocation2 + $0x28] sm:$0xff] %v2743_v0 }
  0x80   : > { %269 = vst [vmem:[#allocation2 + $0x30] sm:$0xff] %v2743_v0  ;;  %270 = vst [vmem:[#allocation2 + $0x38] sm:$0xff] %v2743_v0 }
  0x81   : > { %271 = vst [vmem:[#allocation2 + $0x40] sm:$0xff] %v2743_v0  ;;  %272 = vst [vmem:[#allocation2 + $0x48] sm:$0xff] %v2743_v0 }
  0x82   : > { %273 = vst [vmem:[#allocation2 + $0x50] sm:$0xff] %v2743_v0  ;;  %274 = vst [vmem:[#allocation2 + $0x58] sm:$0xff] %v2743_v0  ;;  %p2023_p4 = scmp.eq.s32.totalorder %s2987_s10, 0 }
  0x83   : > { %275 = vst [vmem:[#allocation2 + $0x60] sm:$0xff] %v2743_v0  ;;  %276 = vst [vmem:[#allocation2 + $0x68] sm:$0xff] %v2743_v0  ;;  %v2333_v1 = vld [vmem:[#allocation8 + $0x4] ss:$16 sps:$4 sm:$0xff] (!%p2023_p4)   ;;  %v2335_v2 = vld [vmem:[#allocation8] ss:$16 sps:$4 sm:$0xff] (!%p2023_p4)  }
  0x84   : > { %277 = vst [vmem:[#allocation2 + $0x70] sm:$0xff] %v2743_v0  ;;  %278 = vst [vmem:[#allocation2 + $0x78] sm:$0xff] %v2743_v0  ;;  %778 = vmatprep.subr.bf16.mxu1 (!%p2023_p4), %v2333_v1  ;;  %v2336_v3 = vld [vmem:[#allocation8 + $0x24] ss:$16 sps:$4 sm:$0xff] (!%p2023_p4)   ;;  %v2338_v4 = vld [vmem:[#allocation8 + $0x20] ss:$16 sps:$4 sm:$0xff] (!%p2023_p4)  }
  0x85   : > { %279 = vst [vmem:[#allocation2 + $0x80] sm:$0xff] %v2743_v0  ;;  %280 = vst [vmem:[#allocation2 + $0x88] sm:$0xff] %v2743_v0  ;;  %779 = vmatpush1.bf16.msra.mxu1 (!%p2023_p4), %v2335_v2  ;;  %v2339_v5 = vld [vmem:[#allocation8 + $0x44] ss:$16 sps:$4 sm:$0xff] (!%p2023_p4)   ;;  %v2341_v6 = vld [vmem:[#allocation8 + $0x40] ss:$16 sps:$4 sm:$0xff] (!%p2023_p4)  }
  0x86   : > { %281 = vst [vmem:[#allocation2 + $0x90] sm:$0xff] %v2743_v0  ;;  %282 = vst [vmem:[#allocation2 + $0x98] sm:$0xff] %v2743_v0  ;;  %297 = sbr.rel (%p2023_p4) target bundleno = 752 (0x2f0), region = 52  ;;  %780 = vmatprep.subr.bf16.mxu1 (!%p2023_p4), %v2336_v3  ;;  %v2342_v7 = vld [vmem:[#allocation8 + $0x64] ss:$16 sps:$4 sm:$0xff] (!%p2023_p4)  }
  0x87   : > { %283 = vst [vmem:[#allocation2 + $0xa0] sm:$0xff] %v2743_v0  ;;  %284 = vst [vmem:[#allocation2 + $0xa8] sm:$0xff] %v2743_v0  ;;  %v2344_v8 = vld [vmem:[#allocation8 + $0x60] ss:$16 sps:$4 sm:$0xff] (!%p2023_p4)   ;;  %v2345_v9 = vld [vmem:[#allocation8 + $0x84] ss:$16 sps:$4 sm:$0xff] (!%p2023_p4)  }
  0x88   : > { %285 = vst [vmem:[#allocation2 + $0xb0] sm:$0xff] %v2743_v0  ;;  %286 = vst [vmem:[#allocation2 + $0xb8] sm:$0xff] %v2743_v0  ;;  %v2347_v10 = vld [vmem:[#allocation8 + $0x80] ss:$16 sps:$4 sm:$0xff] (!%p2023_p4)   ;;  %v2348_v11 = vld [vmem:[#allocation8 + $0xa4] ss:$16 sps:$4 sm:$0xff] (!%p2023_p4)  }
  0x89   : > { %287 = vst [vmem:[#allocation2 + $0xc0] sm:$0xff] %v2743_v0  ;;  %288 = vst [vmem:[#allocation2 + $0xc8] sm:$0xff] %v2743_v0  ;;  %781 = vmatpush1.bf16.msra.mxu1 (!%p2023_p4), %v2338_v4  ;;  %v2350_v12 = vld [vmem:[#allocation8 + $0xa0] ss:$16 sps:$4 sm:$0xff] (!%p2023_p4)   ;;  %v2351_v13 = vld [vmem:[#allocation8 + $0xc4] ss:$16 sps:$4 sm:$0xff] (!%p2023_p4)  }
  0x8a   : > { %289 = vst [vmem:[#allocation2 + $0xd0] sm:$0xff] %v2743_v0  ;;  %290 = vst [vmem:[#allocation2 + $0xd8] sm:$0xff] %v2743_v0  ;;  %782 = vmatprep.subr.bf16.mxu1 (!%p2023_p4), %v2339_v5  ;;  %v2995_v14 = vld [vmem:[%s2976_s24 + $0x4] ss:$8 sps:$4 sm:$0xff] (!%p2023_p4)   ;;  %v2353_v15 = vld [vmem:[#allocation8 + $0xc0] ss:$16 sps:$4 sm:$0xff] (!%p2023_p4)  }
  0x8b   : > { %291 = vst [vmem:[#allocation2 + $0xe0] sm:$0xff] %v2743_v0  ;;  %292 = vst [vmem:[#allocation2 + $0xe8] sm:$0xff] %v2743_v0  ;;  %v2354_v16 = vld [vmem:[#allocation8 + $0xe4] ss:$16 sps:$4 sm:$0xff] (!%p2023_p4)   ;;  %810 = vmatprep.mubr.bf16.mxu1 (!%p2023_p4), %v2995_v14  ;;  %v2356_v17 = vld [vmem:[#allocation8 + $0xe0] ss:$16 sps:$4 sm:$0xff] (!%p2023_p4)  }
  0x8c   : > { %293 = vst [vmem:[#allocation2 + $0xf0] sm:$0xff] %v2743_v0  ;;  %294 = vst [vmem:[#allocation2 + $0xf8] sm:$0xff] %v2743_v0  ;;  %v2357_v18 = vld [vmem:[#allocation8 + $0x104] ss:$16 sps:$4 sm:$0xff] (!%p2023_p4)   ;;  %v2359_v19 = vld [vmem:[#allocation8 + $0x100] ss:$16 sps:$4 sm:$0xff] (!%p2023_p4)  }
  0x8d   : > { %783 = vmatpush1.bf16.msra.mxu1 %v2341_v6  ;;  %v2360_v20 = vld [vmem:[#allocation8 + $0x124] ss:$16 sps:$4 sm:$0xff]   ;;  %v2362_v21 = vld [vmem:[#allocation8 + $0x120] ss:$16 sps:$4 sm:$0xff]   ;;  %v2386_v37 = vld [vmem:[#allocation8 + $0xc] ss:$16 sps:$4 sm:$0xff]  }
  0x8e   : > { %784 = vmatprep.subr.bf16.mxu1 %v2342_v7  ;;  %v2363_v22 = vld [vmem:[#allocation8 + $0x144] ss:$16 sps:$4 sm:$0xff]   ;;  %v2365_v23 = vld [vmem:[#allocation8 + $0x140] ss:$16 sps:$4 sm:$0xff]   ;;  %v2384_v41 = vld [vmem:[#allocation8 + $0x8] ss:$16 sps:$4 sm:$0xff]  }
  0x8f   : > { %v2366_v24 = vld [vmem:[#allocation8 + $0x164] ss:$16 sps:$4 sm:$0xff]   ;;  %v2368_v25 = vld [vmem:[#allocation8 + $0x160] ss:$16 sps:$4 sm:$0xff]   ;;  %v2389_v43 = vld [vmem:[#allocation8 + $0x2c] ss:$16 sps:$4 sm:$0xff]  }
  0x90   : > { %v2369_v26 = vld [vmem:[#allocation8 + $0x184] ss:$16 sps:$4 sm:$0xff]   ;;  %v2371_v27 = vld [vmem:[#allocation8 + $0x180] ss:$16 sps:$4 sm:$0xff]   ;;  %v2387_v46 = vld [vmem:[#allocation8 + $0x28] ss:$16 sps:$4 sm:$0xff]  }
  0x91   : > { %785 = vmatpush1.bf16.msra.mxu1 %v2344_v8  ;;  %v2372_v28 = vld [vmem:[#allocation8 + $0x1a4] ss:$16 sps:$4 sm:$0xff]   ;;  %v2374_v29 = vld [vmem:[#allocation8 + $0x1a0] ss:$16 sps:$4 sm:$0xff]   ;;  %v2395_v48 = vld [vmem:[#allocation8 + $0x4c] ss:$16 sps:$4 sm:$0xff]  }
  0x92   : > { %786 = vmatprep.subr.bf16.mxu1 %v2345_v9  ;;  %v2375_v30 = vld [vmem:[#allocation8 + $0x1c4] ss:$16 sps:$4 sm:$0xff]   ;;  %v2377_v31 = vld [vmem:[#allocation8 + $0x1c0] ss:$16 sps:$4 sm:$0xff]   ;;  %v2393_v49 = vld [vmem:[#allocation8 + $0x48] ss:$16 sps:$4 sm:$0xff]  }
  0x93   : > { %v2378_v32 = vld [vmem:[#allocation8 + $0x1e4] ss:$16 sps:$4 sm:$0xff]   ;;  %v2455_v34 = vld [vmem:[#allocation10] ss:$8 sps:$4 sm:$0xff]   ;;  %v2458_v38 = vld [vmem:[#allocation10 + $0x10] ss:$8 sps:$4 sm:$0xff]  }
  0x94   : > { %v2453_v33 = vld [vmem:[#allocation10 + $0x4] ss:$8 sps:$4 sm:$0xff]   ;;  %v2456_v35 = vld [vmem:[#allocation10 + $0x14] ss:$8 sps:$4 sm:$0xff]   ;;  %v2380_v36 = vld [vmem:[#allocation8 + $0x1e0] ss:$16 sps:$4 sm:$0xff]  }
  0x95   : > { %787 = vmatpush1.bf16.msra.mxu1 %v2347_v10  ;;  %1452 = vmatprep.subr.bf16.mxu0 %v2453_v33  ;;  %v2999_v39 = vld [vmem:[%s2976_s24] ss:$8 sps:$4 sm:$0xff]   ;;  %v2459_v40 = vld [vmem:[#allocation10 + $0x24] ss:$8 sps:$4 sm:$0xff]   ;;  %v3002_v42 = vld [vmem:[%s2976_s24 + $0x14] ss:$8 sps:$4 sm:$0xff]  }
  0x96   : > { %788 = vmatprep.subr.bf16.mxu1 %v2348_v11  ;;  %1453 = vmatpush1.bf16.msra.mxu0 %v2455_v34  ;;  %v2461_v44 = vld [vmem:[#allocation10 + $0x20] ss:$8 sps:$4 sm:$0xff]   ;;  %v2462_v45 = vld [vmem:[#allocation10 + $0x34] ss:$8 sps:$4 sm:$0xff]   ;;  %v3007_v47 = vld [vmem:[%s2976_s24 + $0x10] ss:$8 sps:$4 sm:$0xff]  }
  0x97   : > { %1454 = vmatprep.subr.bf16.mxu0 %v2456_v35  ;;  %v2464_v50 = vld [vmem:[#allocation10 + $0x30] ss:$8 sps:$4 sm:$0xff]   ;;  %v2398_v51 = vld [vmem:[#allocation8 + $0x6c] ss:$16 sps:$4 sm:$0xff]   ;;  %v2467_v54 = vld [vmem:[#allocation10 + $0x40] ss:$8 sps:$4 sm:$0xff]  }
  0x98   : > { %v2465_v52 = vld [vmem:[#allocation10 + $0x44] ss:$8 sps:$4 sm:$0xff]   ;;  %v2468_v55 = vld [vmem:[#allocation10 + $0x54] ss:$8 sps:$4 sm:$0xff]   ;;  %v2396_v56 = vld [vmem:[#allocation8 + $0x68] ss:$16 sps:$4 sm:$0xff]  }
  0x99   : > { %789 = vmatpush1.bf16.msra.mxu1 %v2350_v12  ;;  %v3010_v53 = vld [vmem:[%s2976_s24 + $0x24] ss:$8 sps:$4 sm:$0xff]   ;;  %v2470_v58 = vld [vmem:[#allocation10 + $0x50] ss:$8 sps:$4 sm:$0xff]   ;;  %v3015_v59 = vld [vmem:[%s2976_s24 + $0x20] ss:$8 sps:$4 sm:$0xff]  }
  0x9a   : > { %790 = vmatprep.subr.bf16.mxu1 %v2351_v13  ;;  %1455 = vmatpush1.bf16.msra.mxu0 %v2458_v38  ;;  %v2404_v57 = vld [vmem:[#allocation8 + $0x8c] ss:$16 sps:$4 sm:$0xff]   ;;  %v2402_v61 = vld [vmem:[#allocation8 + $0x88] ss:$16 sps:$4 sm:$0xff]  }
  0x9b   : > { %1456 = vmatprep.subr.bf16.mxu0 %v2459_v40  ;;  %v2471_v60 = vld [vmem:[#allocation10 + $0x64] ss:$8 sps:$4 sm:$0xff]   ;;  %v3018_v62 = vld [vmem:[%s2976_s24 + $0x34] ss:$8 sps:$4 sm:$0xff]   ;;  %v2473_v0 = vld [vmem:[#allocation10 + $0x60] ss:$8 sps:$4 sm:$0xff]  }
  0x9c   : > { %v2407_v63 = vld [vmem:[#allocation8 + $0xac] ss:$16 sps:$4 sm:$0xff]   ;;  %v2405_v2 = vld [vmem:[#allocation8 + $0xa8] ss:$16 sps:$4 sm:$0xff]  }
  0x9d   : > { %791 = vmatpush1.bf16.msra.mxu1 %v2353_v15  ;;  %v2474_v1 = vld [vmem:[#allocation10 + $0x74] ss:$8 sps:$4 sm:$0xff]   ;;  %v2476_v4 = vld [vmem:[#allocation10 + $0x70] ss:$8 sps:$4 sm:$0xff]   ;;  %v2477_v6 = vld [vmem:[#allocation10 + $0x84] ss:$8 sps:$4 sm:$0xff]  }
  0x9e   : > { %792 = vmatprep.subr.bf16.mxu1 %v2354_v16  ;;  %1457 = vmatpush1.bf16.msra.mxu0 %v2461_v44  ;;  %v2413_v3 = vld [vmem:[#allocation8 + $0xcc] ss:$16 sps:$4 sm:$0xff]   ;;  %v3023_v5 = vld [vmem:[%s2976_s24 + $0x30] ss:$8 sps:$4 sm:$0xff]   ;;  %v2479_v10 = vld [vmem:[#allocation10 + $0x80] ss:$8 sps:$4 sm:$0xff]  }
  0x9f   : > { %1458 = vmatprep.subr.bf16.mxu0 %v2462_v45  ;;  %v2411_v7 = vld [vmem:[#allocation8 + $0xc8] ss:$16 sps:$4 sm:$0xff]   ;;  %v3026_v8 = vld [vmem:[%s2976_s24 + $0x44] ss:$8 sps:$4 sm:$0xff]   ;;  %v2480_v11 = vld [vmem:[#allocation10 + $0x94] ss:$8 sps:$4 sm:$0xff]  }
  0xa0   : > { %v2416_v9 = vld [vmem:[#allocation8 + $0xec] ss:$16 sps:$4 sm:$0xff]   ;;  %v2414_v12 = vld [vmem:[#allocation8 + $0xe8] ss:$16 sps:$4 sm:$0xff]  }
  0xa1   : > { %793 = vmatpush1.bf16.msra.mxu1 %v2356_v17  ;;  %v2422_v13 = vld [vmem:[#allocation8 + $0x10c] ss:$16 sps:$4 sm:$0xff]   ;;  %v2482_v15 = vld [vmem:[#allocation10 + $0x90] ss:$8 sps:$4 sm:$0xff]   ;;  %v3031_v16 = vld [vmem:[%s2976_s24 + $0x40] ss:$8 sps:$4 sm:$0xff]  }
  0xa2   : > { %794 = vmatprep.subr.bf16.mxu1 %v2357_v18  ;;  %1459 = vmatpush1.bf16.msra.mxu0 %v2464_v50  ;;  %v2483_v17 = vld [vmem:[#allocation10 + $0xa4] ss:$8 sps:$4 sm:$0xff]   ;;  %v2420_v18 = vld [vmem:[#allocation8 + $0x108] ss:$16 sps:$4 sm:$0xff]   ;;  %v2444_v40 = vld [vmem:[%s2976_s24 + $0x74] ss:$8 sps:$4 sm:$0xff]  }
  0xa3   : > { %1460 = vmatprep.subr.bf16.mxu0 %v2465_v52  ;;  %v2432_v33 = vld [vmem:[#allocation8 + $0x168] ss:$16 sps:$4 sm:$0xff]   ;;  %v2440_v34 = vld [vmem:[#allocation8 + $0x18c] ss:$16 sps:$4 sm:$0xff]  }
  0xa4   : > { %v2494_v35 = vld [vmem:[#allocation10 + $0xd0] ss:$8 sps:$4 sm:$0xff]   ;;  %v2449_v44 = vld [vmem:[#allocation8 + $0x1cc] ss:$16 sps:$4 sm:$0xff]   ;;  %v2497_v50 = vld [vmem:[#allocation10 + $0xe0] ss:$8 sps:$4 sm:$0xff]  }
  0xa5   : > { %795 = vmatpush1.bf16.msra.mxu1 %v2359_v19  ;;  %v3034_v19 = vld [vmem:[%s2976_s24 + $0x54] ss:$8 sps:$4 sm:$0xff]   ;;  %v2438_v38 = vld [vmem:[#allocation8 + $0x188] ss:$16 sps:$4 sm:$0xff]  }
  0xa6   : > { %796 = vmatprep.subr.bf16.mxu1 %v2360_v20  ;;  %1461 = vmatpush1.bf16.msra.mxu0 %v2467_v54  ;;  %v2425_v20 = vld [vmem:[#allocation8 + $0x12c] ss:$16 sps:$4 sm:$0xff]   ;;  %v2446_v45 = vld [vmem:[%s2976_s24 + $0x70] ss:$8 sps:$4 sm:$0xff]  }
  0xa7   : > { %1462 = vmatprep.subr.bf16.mxu0 %v2468_v55  ;;  %v2500_v52 = vld [vmem:[#allocation10 + $0xf0] ss:$8 sps:$4 sm:$0xff]  }
  0xa9   : > { %797 = vmatpush1.bf16.msra.mxu1 %v2362_v21  ;;  %v2485_v21 = vld [vmem:[#allocation10 + $0xa0] ss:$8 sps:$4 sm:$0xff]  }
  0xaa   : > { %798 = vmatprep.subr.bf16.mxu1 %v2363_v22  ;;  %1463 = vmatpush1.bf16.msra.mxu0 %v2470_v58  ;;  %v2486_v22 = vld [vmem:[#allocation10 + $0xb4] ss:$8 sps:$4 sm:$0xff]  }
  0xab   : > { %1464 = vmatprep.subr.bf16.mxu0 %v2471_v60 }
  0xad   : > { %799 = vmatpush1.bf16.msra.mxu1 %v2365_v23  ;;  %v2423_v23 = vld [vmem:[#allocation8 + $0x128] ss:$16 sps:$4 sm:$0xff]  }
  0xae   : > { %800 = vmatprep.subr.bf16.mxu1 %v2366_v24  ;;  %1465 = vmatpush1.bf16.msra.mxu0 %v2473_v0  ;;  %v2431_v24 = vld [vmem:[#allocation8 + $0x14c] ss:$16 sps:$4 sm:$0xff]  }
  0xaf   : > { %1466 = vmatprep.subr.bf16.mxu0 %v2474_v1 }
  0xb1   : > { %801 = vmatpush1.bf16.msra.mxu1 %v2368_v25  ;;  %v2488_v25 = vld [vmem:[#allocation10 + $0xb0] ss:$8 sps:$4 sm:$0xff]  }
  0xb2   : > { %802 = vmatprep.subr.bf16.mxu1 %v2369_v26  ;;  %1467 = vmatpush1.bf16.msra.mxu0 %v2476_v4  ;;  %v3039_v26 = vld [vmem:[%s2976_s24 + $0x50] ss:$8 sps:$4 sm:$0xff]  }
  0xb3   : > { %1468 = vmatprep.subr.bf16.mxu0 %v2477_v6 }
  0xb5   : > { %803 = vmatpush1.bf16.msra.mxu1 %v2371_v27  ;;  %v2489_v27 = vld [vmem:[#allocation10 + $0xc4] ss:$8 sps:$4 sm:$0xff]  }
  0xb6   : > { %804 = vmatprep.subr.bf16.mxu1 %v2372_v28  ;;  %1469 = vmatpush1.bf16.msra.mxu0 %v2479_v10  ;;  %v2429_v28 = vld [vmem:[#allocation8 + $0x148] ss:$16 sps:$4 sm:$0xff]  }
  0xb7   : > { %1470 = vmatprep.subr.bf16.mxu0 %v2480_v11 }
  0xb9   : > { %805 = vmatpush1.bf16.msra.mxu1 %v2374_v29  ;;  %v2435_v29 = vld [vmem:[%s2976_s24 + $0x64] ss:$8 sps:$4 sm:$0xff]  }
  0xba   : > { %806 = vmatprep.subr.bf16.mxu1 %v2375_v30  ;;  %1471 = vmatpush1.bf16.msra.mxu0 %v2482_v15  ;;  %v2434_v30 = vld [vmem:[#allocation8 + $0x16c] ss:$16 sps:$4 sm:$0xff]  }
  0xbb   : > { %1472 = vmatprep.subr.bf16.mxu0 %v2483_v17 }
  0xbd   : > { %807 = vmatpush1.bf16.msra.mxu1 %v2377_v31  ;;  %v2491_v31 = vld [vmem:[#allocation10 + $0xc0] ss:$8 sps:$4 sm:$0xff]  }
  0xbe   : > { %808 = vmatprep.subr.bf16.mxu1 %v2378_v32  ;;  %1473 = vmatpush1.bf16.msra.mxu0 %v2485_v21  ;;  %v2492_v32 = vld [vmem:[#allocation10 + $0xd4] ss:$8 sps:$4 sm:$0xff]  }
  0xbf   : > { %1474 = vmatprep.subr.bf16.mxu0 %v2486_v22 }
  0xc1   : > { %809 = vmatpush1.bf16.msra.mxu1 %v2380_v36  ;;  %v2437_v36 = vld [vmem:[%s2976_s24 + $0x60] ss:$8 sps:$4 sm:$0xff]  }
  0xc2   : > { %891 = vmatprep.subr.bf16.mxu1 %v2386_v37  ;;  %1475 = vmatpush1.bf16.msra.mxu0 %v2488_v25  ;;  %v2495_v37 = vld [vmem:[#allocation10 + $0xe4] ss:$8 sps:$4 sm:$0xff]  }
  0xc3   : > { %1476 = vmatprep.subr.bf16.mxu0 %v2489_v27 }
  0xc4   : > { %811 = vmatmul.mubr.bf16.vlgmr.msra.gmra.mrb[0].mxu1 %v2999_v39 }
  0xc5   : > { %892 = vmatpush1.bf16.msra.mxu1 %v2384_v41  ;;  %820 = vmatprep.mubr.bf16.mxu1 %v3002_v42  ;;  %v2443_v41 = vld [vmem:[#allocation8 + $0x1ac] ss:$16 sps:$4 sm:$0xff]  }
  0xc6   : > { %893 = vmatprep.subr.bf16.mxu1 %v2389_v43  ;;  %1477 = vmatpush1.bf16.msra.mxu0 %v2491_v31  ;;  %v2441_v43 = vld [vmem:[#allocation8 + $0x1a8] ss:$16 sps:$4 sm:$0xff]  }
  0xc7   : > { %1478 = vmatprep.subr.bf16.mxu0 %v2492_v32 }
  0xc9   : > { %894 = vmatpush1.bf16.msra.mxu1 %v2387_v46  ;;  %v2447_v46 = vld [vmem:[#allocation8 + $0x1c8] ss:$16 sps:$4 sm:$0xff]  }
  0xca   : > { %895 = vmatprep.subr.bf16.mxu1 %v2395_v48  ;;  %1479 = vmatpush1.bf16.msra.mxu0 %v2494_v35  ;;  %v2452_v48 = vld [vmem:[#allocation8 + $0x1ec] ss:$16 sps:$4 sm:$0xff]  }
  0xcb   : > { %1480 = vmatprep.subr.bf16.mxu0 %v2495_v37 }
  0xcc   : > { %821 = vmatmul.mubr.bf16.gmra.mrb[4].mxu1 %v3007_v47 }
  0xcd   : > { %896 = vmatpush1.bf16.msra.mxu1 %v2393_v49  ;;  %830 = vmatprep.mubr.bf16.mxu1 %v3010_v53  ;;  %v2450_v49 = vld [vmem:[#allocation8 + $0x1e8] ss:$16 sps:$4 sm:$0xff]  }
  0xce   : > { %897 = vmatprep.subr.bf16.mxu1 %v2398_v51  ;;  %1481 = vmatpush1.bf16.msra.mxu0 %v2497_v50  ;;  %v2498_v51 = vld [vmem:[#allocation10 + $0xf4] ss:$8 sps:$4 sm:$0xff]  }
  0xcf   : > { %1482 = vmatprep.subr.bf16.mxu0 %v2498_v51  ;;  %v2539_v51 = vld [vmem:[#allocation10 + $0x1c4] ss:$8 sps:$4 sm:$0xff]  }
  0xd1   : > { %898 = vmatpush1.bf16.msra.mxu1 %v2396_v56  ;;  %v2501_v56 = vld [vmem:[#allocation10 + $0x100] ss:$8 sps:$4 sm:$0xff]  }
  0xd2   : > { %899 = vmatprep.subr.bf16.mxu1 %v2404_v57  ;;  %1483 = vmatpush1.bf16.msra.mxu0 %v2500_v52  ;;  %v2506_v57 = vld [vmem:[#allocation10 + $0x114] ss:$8 sps:$4 sm:$0xff]  }
  0xd4   : > { %831 = vmatmul.mubr.bf16.gmra.mrb[8].mxu1 %v3015_v59 }
  0xd5   : > { %900 = vmatpush1.bf16.msra.mxu1 %v2402_v61  ;;  %840 = vmatprep.mubr.bf16.mxu1 %v3018_v62  ;;  %v2509_v61 = vld [vmem:[#allocation10 + $0x124] ss:$8 sps:$4 sm:$0xff]  }
  0xd6   : > { %901 = vmatprep.subr.bf16.mxu1 %v2407_v63 }
  0xd9   : > { %902 = vmatpush1.bf16.msra.mxu1 %v2405_v2  ;;  %v2507_v2 = vld [vmem:[#allocation10 + $0x120] ss:$8 sps:$4 sm:$0xff]  }
  0xda   : > { %903 = vmatprep.subr.bf16.mxu1 %v2413_v3  ;;  %v2512_v3 = vld [vmem:[#allocation10 + $0x134] ss:$8 sps:$4 sm:$0xff]  }
  0xdc   : > { %841 = vmatmul.mubr.bf16.gmra.mrb[12].mxu1 %v3023_v5 }
  0xdd   : > { %904 = vmatpush1.bf16.msra.mxu1 %v2411_v7  ;;  %850 = vmatprep.mubr.bf16.mxu1 %v3026_v8  ;;  %v2515_v7 = vld [vmem:[#allocation10 + $0x144] ss:$8 sps:$4 sm:$0xff]  }
  0xde   : > { %905 = vmatprep.subr.bf16.mxu1 %v2416_v9 }
  0xe1   : > { %906 = vmatpush1.bf16.msra.mxu1 %v2414_v12  ;;  %v2513_v12 = vld [vmem:[#allocation10 + $0x140] ss:$8 sps:$4 sm:$0xff]  }
  0xe2   : > { %907 = vmatprep.subr.bf16.mxu1 %v2422_v13  ;;  %v2518_v13 = vld [vmem:[#allocation10 + $0x154] ss:$8 sps:$4 sm:$0xff]  }
  0xe4   : > { %851 = vmatmul.mubr.bf16.gmra.mrb[16].mxu1 %v3031_v16 }
  0xe5   : > { %908 = vmatpush1.bf16.msra.mxu1 %v2420_v18  ;;  %860 = vmatprep.mubr.bf16.mxu1 %v3034_v19  ;;  %v2521_v18 = vld [vmem:[#allocation10 + $0x164] ss:$8 sps:$4 sm:$0xff]  }
  0xe6   : > { %909 = vmatprep.subr.bf16.mxu1 %v2425_v20 }
  0xe9   : > { %910 = vmatpush1.bf16.msra.mxu1 %v2423_v23  ;;  %v2519_v23 = vld [vmem:[#allocation10 + $0x160] ss:$8 sps:$4 sm:$0xff]  }
  0xea   : > { %911 = vmatprep.subr.bf16.mxu1 %v2431_v24  ;;  %v2524_v24 = vld [vmem:[#allocation10 + $0x174] ss:$8 sps:$4 sm:$0xff]  }
  0xec   : > { %861 = vmatmul.mubr.bf16.gmra.mrb[20].mxu1 %v3039_v26 }
  0xed   : > { %912 = vmatpush1.bf16.msra.mxu1 %v2429_v28  ;;  %870 = vmatprep.mubr.bf16.mxu1 %v2435_v29  ;;  %v2527_v28 = vld [vmem:[#allocation10 + $0x184] ss:$8 sps:$4 sm:$0xff]  }
  0xee   : > { %913 = vmatprep.subr.bf16.mxu1 %v2434_v30 }
  0xf1   : > { %914 = vmatpush1.bf16.msra.mxu1 %v2432_v33  ;;  %v2525_v33 = vld [vmem:[#allocation10 + $0x180] ss:$8 sps:$4 sm:$0xff]  }
  0xf2   : > { %915 = vmatprep.subr.bf16.mxu1 %v2440_v34  ;;  %v2530_v34 = vld [vmem:[#allocation10 + $0x194] ss:$8 sps:$4 sm:$0xff]  }
  0xf4   : > { %871 = vmatmul.mubr.bf16.gmra.mrb[24].mxu1 %v2437_v36 }
  0xf5   : > { %916 = vmatpush1.bf16.msra.mxu1 %v2438_v38  ;;  %880 = vmatprep.mubr.bf16.mxu1 %v2444_v40  ;;  %v2533_v38 = vld [vmem:[#allocation10 + $0x1a4] ss:$8 sps:$4 sm:$0xff]  }
  0xf6   : > { %917 = vmatprep.subr.bf16.mxu1 %v2443_v41 }
  0xf9   : > { %918 = vmatpush1.bf16.msra.mxu1 %v2441_v43 }
  0xfa   : > { %919 = vmatprep.subr.bf16.mxu1 %v2449_v44 }
  0xfc   : > { %881 = vmatmul.mubr.bf16.gmra.mrb[28].mxu1 %v2446_v45 }
  0xfd   : > { %920 = vmatpush1.bf16.msra.mxu1 %v2447_v46  ;;  %923 = vmatprep.mubr.bf16.mxu1 %v2995_v14  ;;  %v2503_v14 = vld [vmem:[#allocation10 + $0x104] ss:$8 sps:$4 sm:$0xff]   ;;  %v2536_v46 = vld [vmem:[#allocation10 + $0x1b4] ss:$8 sps:$4 sm:$0xff]  }
  0xfe   : > { %921 = vmatprep.subr.bf16.mxu1 %v2452_v48  ;;  %1565 = vmatprep.subr.bf16.mxu0 %v2503_v14 }
 0x101   : > { %922 = vmatpush1.bf16.msra.mxu1 %v2450_v49  ;;  %v2534_v49 = vld [vmem:[#allocation10 + $0x1b0] ss:$8 sps:$4 sm:$0xff]  }
 0x104   : > { %924 = vmatmul.mubr.bf16.vlgmr.msra.gmra.mrb[32].mxu1 %v2999_v39 }
 0x105   : > { %933 = vmatprep.mubr.bf16.mxu1 %v3002_v42 }
 0x10c   : > { %934 = vmatmul.mubr.bf16.gmra.mrb[36].mxu1 %v3007_v47 }
 0x10d   : > { %943 = vmatprep.mubr.bf16.mxu1 %v3010_v53 }
 0x114   : > { %944 = vmatmul.mubr.bf16.gmra.mrb[40].mxu1 %v3015_v59  ;;  %v2504_v59 = vld [vmem:[#allocation10 + $0x110] ss:$8 sps:$4 sm:$0xff]  }
 0x115   : > { %953 = vmatprep.mubr.bf16.mxu1 %v3018_v62 }
 0x11c   : > { %954 = vmatmul.mubr.bf16.gmra.mrb[44].mxu1 %v3023_v5  ;;  %v2510_v5 = vld [vmem:[#allocation10 + $0x130] ss:$8 sps:$4 sm:$0xff]  }
 0x11d   : > { %963 = vmatprep.mubr.bf16.mxu1 %v3026_v8 }
 0x124   : > { %964 = vmatmul.mubr.bf16.gmra.mrb[48].mxu1 %v3031_v16  ;;  %v2516_v16 = vld [vmem:[#allocation10 + $0x150] ss:$8 sps:$4 sm:$0xff]  }
 0x125   : > { %973 = vmatprep.mubr.bf16.mxu1 %v3034_v19 }
 0x12c   : > { %974 = vmatmul.mubr.bf16.gmra.mrb[52].mxu1 %v3039_v26  ;;  %v2522_v26 = vld [vmem:[#allocation10 + $0x170] ss:$8 sps:$4 sm:$0xff]  }
 0x12d   : > { %983 = vmatprep.mubr.bf16.mxu1 %v2435_v29 }
 0x134   : > { %984 = vmatmul.mubr.bf16.gmra.mrb[56].mxu1 %v2437_v36  ;;  %v2528_v36 = vld [vmem:[#allocation10 + $0x190] ss:$8 sps:$4 sm:$0xff]  }
 0x135   : > { %993 = vmatprep.mubr.bf16.mxu1 %v2444_v40 }
 0x13c   : > { %994 = vmatmul.mubr.bf16.gmra.mrb[60].mxu1 %v2446_v45  ;;  %v2531_v45 = vld [vmem:[#allocation10 + $0x1a0] ss:$8 sps:$4 sm:$0xff]  }
 0x197   : > { %v812_v39 = vpop.f32.mrb[0].mxu1 }
 0x198   : > { %v814_v42 = vpop.f32.mrb[1].mxu1 }
 0x199   : > { %v816_v47 = vpop.f32.mrb[2].mxu1 }
 0x19a   : > { %v1036_v53 = vpack.c.bf16 %v816_v47, %v812_v39  ;;  %v818_v54 = vpop.f32.mrb[3].mxu1  ;;  %v2537_v47 = vld [vmem:[#allocation10 + $0x1c0] ss:$8 sps:$4 sm:$0xff]  }
 0x19b   : > { %v1037_v55 = vpack.c.bf16 %v818_v54, %v814_v42 }
 0x19d   : > { %1484 = vmatprep.mubr.bf16.mxu0 %v1037_v55  ;;  %v2540_v55 = vld [vmem:[#allocation10 + $0x1d0] ss:$8 sps:$4 sm:$0xff]  }
 0x19e   : > { %1485 = vmatmul.mubr.bf16.vlgmr.msra.gmra.mrb[0].mxu0 %v1036_v53  ;;  %v2542_v53 = vld [vmem:[#allocation10 + $0x1d4] ss:$8 sps:$4 sm:$0xff]  }
 0x19f   : > { %v822_v58 = vpop.f32.mrb[4].mxu1  ;;  %1566 = vmatpush1.bf16.msra.mxu0 %v2501_v56 }
 0x1a0   : > { %v824_v60 = vpop.f32.mrb[5].mxu1  ;;  %1567 = vmatprep.subr.bf16.mxu0 %v2506_v57  ;;  %v2545_v57 = vld [vmem:[#allocation10 + $0x1e4] ss:$8 sps:$4 sm:$0xff]  }
 0x1a1   : > { %v826_v62 = vpop.f32.mrb[6].mxu1 }
 0x1a2   : > { %v1040_v63 = vpack.c.bf16 %v826_v62, %v822_v58  ;;  %v828_v0 = vpop.f32.mrb[7].mxu1  ;;  %v2543_v62 = vld [vmem:[#allocation10 + $0x1e0] ss:$8 sps:$4 sm:$0xff]  }
 0x1a3   : > { %v1041_v1 = vpack.c.bf16 %v828_v0, %v824_v60  ;;  %1568 = vmatpush1.bf16.msra.mxu0 %v2504_v59 }
 0x1a4   : > { %1569 = vmatprep.subr.bf16.mxu0 %v2509_v61 }
 0x1a5   : > { %1494 = vmatprep.mubr.bf16.mxu0 %v1041_v1  ;;  %v2546_v1 = vld [vmem:[#allocation10 + $0x1f0] ss:$8 sps:$4 sm:$0xff]  }
 0x1a6   : > { %1495 = vmatmul.mubr.bf16.gmra.mrb[4].mxu0 %v1040_v63  ;;  %v2548_v63 = vld [vmem:[#allocation10 + $0x1f4] ss:$8 sps:$4 sm:$0xff]  }
 0x1a7   : > { %v832_v4 = vpop.f32.mrb[8].mxu1  ;;  %1570 = vmatpush1.bf16.msra.mxu0 %v2507_v2 }
 0x1a8   : > { %v834_v6 = vpop.f32.mrb[9].mxu1  ;;  %1571 = vmatprep.subr.bf16.mxu0 %v2512_v3 }
 0x1a9   : > { %v836_v8 = vpop.f32.mrb[10].mxu1 }
 0x1aa   : > { %v1044_v9 = vpack.c.bf16 %v836_v8, %v832_v4  ;;  %v838_v10 = vpop.f32.mrb[11].mxu1 }
 0x1ab   : > { %v1045_v11 = vpack.c.bf16 %v838_v10, %v834_v6  ;;  %1572 = vmatpush1.bf16.msra.mxu0 %v2510_v5 }
 0x1ac   : > { %1573 = vmatprep.subr.bf16.mxu0 %v2515_v7 }
 0x1ad   : > { %1504 = vmatprep.mubr.bf16.mxu0 %v1045_v11 }
 0x1ae   : > { %1505 = vmatmul.mubr.bf16.gmra.mrb[8].mxu0 %v1044_v9 }
 0x1af   : > { %v842_v15 = vpop.f32.mrb[12].mxu1  ;;  %1574 = vmatpush1.bf16.msra.mxu0 %v2513_v12 }
 0x1b0   : > { %v844_v17 = vpop.f32.mrb[13].mxu1  ;;  %1575 = vmatprep.subr.bf16.mxu0 %v2518_v13 }
 0x1b1   : > { %v846_v19 = vpop.f32.mrb[14].mxu1 }
 0x1b2   : > { %v1048_v20 = vpack.c.bf16 %v846_v19, %v842_v15  ;;  %v848_v21 = vpop.f32.mrb[15].mxu1 }
 0x1b3   : > { %v1049_v22 = vpack.c.bf16 %v848_v21, %v844_v17  ;;  %1576 = vmatpush1.bf16.msra.mxu0 %v2516_v16 }
 0x1b4   : > { %1577 = vmatprep.subr.bf16.mxu0 %v2521_v18 }
 0x1b5   : > { %1514 = vmatprep.mubr.bf16.mxu0 %v1049_v22 }
 0x1b6   : > { %1515 = vmatmul.mubr.bf16.gmra.mrb[12].mxu0 %v1048_v20 }
 0x1b7   : > { %v852_v25 = vpop.f32.mrb[16].mxu1  ;;  %1578 = vmatpush1.bf16.msra.mxu0 %v2519_v23 }
 0x1b8   : > { %v854_v27 = vpop.f32.mrb[17].mxu1  ;;  %1579 = vmatprep.subr.bf16.mxu0 %v2524_v24 }
 0x1b9   : > { %v856_v29 = vpop.f32.mrb[18].mxu1 }
 0x1ba   : > { %v1052_v30 = vpack.c.bf16 %v856_v29, %v852_v25  ;;  %v858_v31 = vpop.f32.mrb[19].mxu1 }
 0x1bb   : > { %v1053_v32 = vpack.c.bf16 %v858_v31, %v854_v27  ;;  %1580 = vmatpush1.bf16.msra.mxu0 %v2522_v26 }
 0x1bc   : > { %1581 = vmatprep.subr.bf16.mxu0 %v2527_v28 }
 0x1bd   : > { %1524 = vmatprep.mubr.bf16.mxu0 %v1053_v32 }
 0x1be   : > { %1525 = vmatmul.mubr.bf16.gmra.mrb[16].mxu0 %v1052_v30 }
 0x1bf   : > { %v862_v35 = vpop.f32.mrb[20].mxu1  ;;  %1582 = vmatpush1.bf16.msra.mxu0 %v2525_v33 }
 0x1c0   : > { %v864_v37 = vpop.f32.mrb[21].mxu1  ;;  %1583 = vmatprep.subr.bf16.mxu0 %v2530_v34 }
 0x1c1   : > { %v866_v40 = vpop.f32.mrb[22].mxu1 }
 0x1c2   : > { %v1056_v41 = vpack.c.bf16 %v866_v40, %v862_v35  ;;  %v868_v43 = vpop.f32.mrb[23].mxu1 }
 0x1c3   : > { %v1057_v44 = vpack.c.bf16 %v868_v43, %v864_v37  ;;  %1584 = vmatpush1.bf16.msra.mxu0 %v2528_v36 }
 0x1c4   : > { %1585 = vmatprep.subr.bf16.mxu0 %v2533_v38 }
 0x1c5   : > { %1534 = vmatprep.mubr.bf16.mxu0 %v1057_v44 }
 0x1c6   : > { %1535 = vmatmul.mubr.bf16.gmra.mrb[20].mxu0 %v1056_v41 }
 0x1c7   : > { %v872_v48 = vpop.f32.mrb[24].mxu1  ;;  %1586 = vmatpush1.bf16.msra.mxu0 %v2531_v45 }
 0x1c8   : > { %v874_v50 = vpop.f32.mrb[25].mxu1  ;;  %1587 = vmatprep.subr.bf16.mxu0 %v2536_v46 }
 0x1c9   : > { %v876_v52 = vpop.f32.mrb[26].mxu1 }
 0x1ca   : > { %v1060_v14 = vpack.c.bf16 %v876_v52, %v872_v48  ;;  %v878_v39 = vpop.f32.mrb[27].mxu1 }
 0x1cb   : > { %v1061_v42 = vpack.c.bf16 %v878_v39, %v874_v50  ;;  %1588 = vmatpush1.bf16.msra.mxu0 %v2534_v49  ;;  %v1005_v39 = vld [vmem:[#allocation2 + $0x8] sm:$0xff] }
 0x1cc   : > { %1589 = vmatprep.subr.bf16.mxu0 %v2539_v51 }
 0x1cd   : > { %1544 = vmatprep.mubr.bf16.mxu0 %v1061_v42 }
 0x1ce   : > { %1545 = vmatmul.mubr.bf16.gmra.mrb[24].mxu0 %v1060_v14  ;;  %v1004_v14 = vld [vmem:[#allocation2] sm:$0xff] }
 0x1cf   : > { %v882_v54 = vpop.f32.mrb[28].mxu1  ;;  %1590 = vmatpush1.bf16.msra.mxu0 %v2537_v47  ;;  %v1006_v47 = vld [vmem:[#allocation2 + $0x10] sm:$0xff] }
 0x1d0   : > { %v884_v56 = vpop.f32.mrb[29].mxu1  ;;  %1591 = vmatprep.subr.bf16.mxu0 %v2542_v53 }
 0x1d1   : > { %v886_v58 = vpop.f32.mrb[30].mxu1 }
 0x1d2   : > { %v1064_v59 = vpack.c.bf16 %v886_v58, %v882_v54  ;;  %v888_v60 = vpop.f32.mrb[31].mxu1 }
 0x1d3   : > { %v1065_v61 = vpack.c.bf16 %v888_v60, %v884_v56  ;;  %1592 = vmatpush1.bf16.msra.mxu0 %v2540_v55  ;;  %v1007_v55 = vld [vmem:[#allocation2 + $0x18] sm:$0xff] }
 0x1d4   : > { %1593 = vmatprep.subr.bf16.mxu0 %v2545_v57 }
 0x1d5   : > { %1554 = vmatprep.mubr.bf16.mxu0 %v1065_v61  ;;  %v1008_v61 = vld [vmem:[#allocation2 + $0x20] sm:$0xff] }
 0x1d6   : > { %1555 = vmatmul.mubr.bf16.gmra.mrb[28].mxu0 %v1064_v59 }
 0x1d7   : > { %v925_v0 = vpop.f32.mrb[32].mxu1  ;;  %1594 = vmatpush1.bf16.msra.mxu0 %v2543_v62  ;;  %v1009_v62 = vld [vmem:[#allocation2 + $0x28] sm:$0xff] }
 0x1d8   : > { %v927_v2 = vpop.f32.mrb[33].mxu1  ;;  %1595 = vmatprep.subr.bf16.mxu0 %v2548_v63 }
 0x1d9   : > { %v929_v3 = vpop.f32.mrb[34].mxu1 }
 0x1da   : > { %v1038_v4 = vpack.c.bf16 %v929_v3, %v925_v0  ;;  %v931_v5 = vpop.f32.mrb[35].mxu1  ;;  %v1010_v0 = vld [vmem:[#allocation2 + $0x30] sm:$0xff]  ;;  %v1011_v3 = vld [vmem:[#allocation2 + $0x38] sm:$0xff] }
 0x1db   : > { %v1039_v6 = vpack.c.bf16 %v931_v5, %v927_v2  ;;  %1596 = vmatpush1.bf16.msra.mxu0 %v2546_v1 }
 0x1dd   : > { %1597 = vmatprep.mubr.bf16.mxu0 %v1039_v6 }
 0x1de   : > { %1598 = vmatmul.mubr.bf16.vlgmr.msra.gmra.mrb[0].mxu0 %v1038_v4 }
 0x1df   : > { %v935_v7 = vpop.f32.mrb[36].mxu1 }
 0x1e0   : > { %v937_v8 = vpop.f32.mrb[37].mxu1 }
 0x1e1   : > { %v939_v9 = vpop.f32.mrb[38].mxu1 }
 0x1e2   : > { %v1042_v10 = vpack.c.bf16 %v939_v9, %v935_v7  ;;  %v941_v11 = vpop.f32.mrb[39].mxu1  ;;  %v1012_v9 = vld [vmem:[#allocation2 + $0x40] sm:$0xff] }
 0x1e3   : > { %v1043_v12 = vpack.c.bf16 %v941_v11, %v937_v8 }
 0x1e5   : > { %1607 = vmatprep.mubr.bf16.mxu0 %v1043_v12  ;;  %v1014_v12 = vld [vmem:[#allocation2 + $0x50] sm:$0xff] }
 0x1e6   : > { %1608 = vmatmul.mubr.bf16.gmra.mrb[4].mxu0 %v1042_v10  ;;  %v1013_v10 = vld [vmem:[#allocation2 + $0x48] sm:$0xff] }
 0x1e7   : > { %v945_v13 = vpop.f32.mrb[40].mxu1 }
 0x1e8   : > { %v947_v15 = vpop.f32.mrb[41].mxu1 }
 0x1e9   : > { %v949_v16 = vpop.f32.mrb[42].mxu1 }
 0x1ea   : > { %v1046_v17 = vpack.c.bf16 %v949_v16, %v945_v13  ;;  %v951_v18 = vpop.f32.mrb[43].mxu1  ;;  %v1015_v16 = vld [vmem:[#allocation2 + $0x58] sm:$0xff] }
 0x1eb   : > { %v1047_v19 = vpack.c.bf16 %v951_v18, %v947_v15 }
 0x1ed   : > { %1617 = vmatprep.mubr.bf16.mxu0 %v1047_v19 }
 0x1ee   : > { %1618 = vmatmul.mubr.bf16.gmra.mrb[8].mxu0 %v1046_v17 }
 0x1ef   : > { %v955_v20 = vpop.f32.mrb[44].mxu1 }
 0x1f0   : > { %v957_v21 = vpop.f32.mrb[45].mxu1 }
 0x1f1   : > { %v959_v22 = vpop.f32.mrb[46].mxu1 }
 0x1f2   : > { %v1050_v23 = vpack.c.bf16 %v959_v22, %v955_v20  ;;  %v961_v24 = vpop.f32.mrb[47].mxu1  ;;  %v1016_v22 = vld [vmem:[#allocation2 + $0x60] sm:$0xff] }
 0x1f3   : > { %v1051_v25 = vpack.c.bf16 %v961_v24, %v957_v21 }
 0x1f5   : > { %1627 = vmatprep.mubr.bf16.mxu0 %v1051_v25  ;;  %v1018_v25 = vld [vmem:[#allocation2 + $0x70] sm:$0xff] }
 0x1f6   : > { %1628 = vmatmul.mubr.bf16.gmra.mrb[12].mxu0 %v1050_v23  ;;  %v1017_v23 = vld [vmem:[#allocation2 + $0x68] sm:$0xff] }
 0x1f7   : > { %v965_v26 = vpop.f32.mrb[48].mxu1 }
 0x1f8   : > { %v967_v27 = vpop.f32.mrb[49].mxu1 }
 0x1f9   : > { %v969_v28 = vpop.f32.mrb[50].mxu1 }
 0x1fa   : > { %v1054_v29 = vpack.c.bf16 %v969_v28, %v965_v26  ;;  %v971_v30 = vpop.f32.mrb[51].mxu1  ;;  %v1019_v28 = vld [vmem:[#allocation2 + $0x78] sm:$0xff] }
 0x1fb   : > { %v1055_v31 = vpack.c.bf16 %v971_v30, %v967_v27 }
 0x1fd   : > { %1637 = vmatprep.mubr.bf16.mxu0 %v1055_v31 }
 0x1fe   : > { %1638 = vmatmul.mubr.bf16.gmra.mrb[16].mxu0 %v1054_v29 }
 0x1ff   : > { %v975_v32 = vpop.f32.mrb[52].mxu1 }
 0x200   : > { %v977_v33 = vpop.f32.mrb[53].mxu1 }
 0x201   : > { %v979_v34 = vpop.f32.mrb[54].mxu1 }
 0x202   : > { %v1058_v35 = vpack.c.bf16 %v979_v34, %v975_v32  ;;  %v981_v36 = vpop.f32.mrb[55].mxu1  ;;  %v1020_v34 = vld [vmem:[#allocation2 + $0x80] sm:$0xff] }
 0x203   : > { %v1059_v37 = vpack.c.bf16 %v981_v36, %v977_v33 }
 0x205   : > { %1647 = vmatprep.mubr.bf16.mxu0 %v1059_v37  ;;  %v1022_v37 = vld [vmem:[#allocation2 + $0x90] sm:$0xff] }
 0x206   : > { %1648 = vmatmul.mubr.bf16.gmra.mrb[20].mxu0 %v1058_v35  ;;  %v1021_v35 = vld [vmem:[#allocation2 + $0x88] sm:$0xff] }
 0x207   : > { %v985_v38 = vpop.f32.mrb[56].mxu1 }
 0x208   : > { %v987_v40 = vpop.f32.mrb[57].mxu1 }
 0x209   : > { %v989_v41 = vpop.f32.mrb[58].mxu1 }
 0x20a   : > { %v1062_v43 = vpack.c.bf16 %v989_v41, %v985_v38  ;;  %v991_v44 = vpop.f32.mrb[59].mxu1  ;;  %v1023_v41 = vld [vmem:[#allocation2 + $0x98] sm:$0xff] }
 0x20b   : > { %v1063_v45 = vpack.c.bf16 %v991_v44, %v987_v40 }
 0x20d   : > { %1657 = vmatprep.mubr.bf16.mxu0 %v1063_v45 }
 0x20e   : > { %1658 = vmatmul.mubr.bf16.gmra.mrb[24].mxu0 %v1062_v43 }
 0x20f   : > { %v995_v46 = vpop.f32.mrb[60].mxu1 }
 0x210   : > { %v997_v48 = vpop.f32.mrb[61].mxu1 }
 0x211   : > { %v999_v49 = vpop.f32.mrb[62].mxu1 }
 0x212   : > { %v1066_v50 = vpack.c.bf16 %v999_v49, %v995_v46  ;;  %v1001_v51 = vpop.f32.mrb[63].mxu1  ;;  %v1024_v49 = vld [vmem:[#allocation2 + $0xa0] sm:$0xff] }
 0x213   : > { %v1067_v52 = vpack.c.bf16 %v1001_v51, %v997_v48 }
 0x215   : > { %1667 = vmatprep.mubr.bf16.mxu0 %v1067_v52  ;;  %v1026_v52 = vld [vmem:[#allocation2 + $0xb0] sm:$0xff] }
 0x216   : > { %1668 = vmatmul.mubr.bf16.gmra.mrb[28].mxu0 %v1066_v50  ;;  %v1025_v50 = vld [vmem:[#allocation2 + $0xa8] sm:$0xff] }
 0x2b1   : > { %v1599_v42 = vpop.f32.mrb[0].mxu0 }
 0x2b2   : > { %v1678_v53 = vadd.f32 %v1599_v42, %v1004_v14  ;;  %v1601_v54 = vpop.f32.mrb[1].mxu0  ;;  %v1027_v42 = vld [vmem:[#allocation2 + $0xb8] sm:$0xff] }
 0x2b3   : > { %v1679_v56 = vadd.f32 %v1601_v54, %v1005_v39  ;;  %v1603_v57 = vpop.f32.mrb[2].mxu0 }
 0x2b4   : > { %1710 = vst [vmem:[#allocation2] sm:$0xff] %v1678_v53  ;;  %v1680_v58 = vadd.f32 %v1603_v57, %v1006_v47  ;;  %v1605_v59 = vpop.f32.mrb[3].mxu0  ;;  %v1028_v57 = vld [vmem:[#allocation2 + $0xc0] sm:$0xff] }
 0x2b5   : > { %1711 = vst [vmem:[#allocation2 + $0x8] sm:$0xff] %v1679_v56  ;;  %v1681_v60 = vadd.f32 %v1605_v59, %v1007_v55 }
 0x2b6   : > { %1712 = vst [vmem:[#allocation2 + $0x10] sm:$0xff] %v1680_v58  ;;  %v1029_v58 = vld [vmem:[#allocation2 + $0xc8] sm:$0xff] }
 0x2b7   : > { %1713 = vst [vmem:[#allocation2 + $0x18] sm:$0xff] %v1681_v60  ;;  %v1030_v60 = vld [vmem:[#allocation2 + $0xd0] sm:$0xff] }
 0x2b9   : > { %v1609_v63 = vpop.f32.mrb[4].mxu0 }
 0x2ba   : > { %v1682_v1 = vadd.f32 %v1609_v63, %v1008_v61  ;;  %v1611_v2 = vpop.f32.mrb[5].mxu0  ;;  %v1031_v63 = vld [vmem:[#allocation2 + $0xd8] sm:$0xff] }
 0x2bb   : > { %v1683_v4 = vadd.f32 %v1611_v2, %v1009_v62  ;;  %v1613_v5 = vpop.f32.mrb[6].mxu0 }
 0x2bc   : > { %1714 = vst [vmem:[#allocation2 + $0x20] sm:$0xff] %v1682_v1  ;;  %v1684_v6 = vadd.f32 %v1613_v5, %v1010_v0  ;;  %v1615_v7 = vpop.f32.mrb[7].mxu0  ;;  %v1032_v5 = vld [vmem:[#allocation2 + $0xe0] sm:$0xff] }
 0x2bd   : > { %1715 = vst [vmem:[#allocation2 + $0x28] sm:$0xff] %v1683_v4  ;;  %v1685_v8 = vadd.f32 %v1615_v7, %v1011_v3 }
 0x2be   : > { %1716 = vst [vmem:[#allocation2 + $0x30] sm:$0xff] %v1684_v6  ;;  %v1033_v6 = vld [vmem:[#allocation2 + $0xe8] sm:$0xff] }
 0x2bf   : > { %1717 = vst [vmem:[#allocation2 + $0x38] sm:$0xff] %v1685_v8  ;;  %v1034_v8 = vld [vmem:[#allocation2 + $0xf0] sm:$0xff] }
 0x2c1   : > { %v1619_v11 = vpop.f32.mrb[8].mxu0 }
 0x2c2   : > { %v1686_v13 = vadd.f32 %v1619_v11, %v1012_v9  ;;  %v1621_v15 = vpop.f32.mrb[9].mxu0  ;;  %v1035_v11 = vld [vmem:[#allocation2 + $0xf8] sm:$0xff] }
 0x2c3   : > { %v1687_v17 = vadd.f32 %v1621_v15, %v1013_v10  ;;  %v1623_v18 = vpop.f32.mrb[10].mxu0 }
 0x2c4   : > { %1718 = vst [vmem:[#allocation2 + $0x40] sm:$0xff] %v1686_v13  ;;  %v1688_v19 = vadd.f32 %v1623_v18, %v1014_v12  ;;  %v1625_v20 = vpop.f32.mrb[11].mxu0 }
 0x2c5   : > { %1719 = vst [vmem:[#allocation2 + $0x48] sm:$0xff] %v1687_v17  ;;  %v1689_v21 = vadd.f32 %v1625_v20, %v1015_v16 }
 0x2c6   : > { %1720 = vst [vmem:[#allocation2 + $0x50] sm:$0xff] %v1688_v19 }
 0x2c7   : > { %1721 = vst [vmem:[#allocation2 + $0x58] sm:$0xff] %v1689_v21 }
 0x2c9   : > { %v1629_v24 = vpop.f32.mrb[12].mxu0 }
 0x2ca   : > { %v1690_v26 = vadd.f32 %v1629_v24, %v1016_v22  ;;  %v1631_v27 = vpop.f32.mrb[13].mxu0 }
 0x2cb   : > { %v1691_v29 = vadd.f32 %v1631_v27, %v1017_v23  ;;  %v1633_v30 = vpop.f32.mrb[14].mxu0 }
 0x2cc   : > { %1722 = vst [vmem:[#allocation2 + $0x60] sm:$0xff] %v1690_v26  ;;  %v1692_v31 = vadd.f32 %v1633_v30, %v1018_v25  ;;  %v1635_v32 = vpop.f32.mrb[15].mxu0 }
 0x2cd   : > { %1723 = vst [vmem:[#allocation2 + $0x68] sm:$0xff] %v1691_v29  ;;  %v1693_v33 = vadd.f32 %v1635_v32, %v1019_v28 }
 0x2ce   : > { %1724 = vst [vmem:[#allocation2 + $0x70] sm:$0xff] %v1692_v31 }
 0x2cf   : > { %1725 = vst [vmem:[#allocation2 + $0x78] sm:$0xff] %v1693_v33 }
 0x2d1   : > { %v1639_v36 = vpop.f32.mrb[16].mxu0 }
 0x2d2   : > { %v1694_v38 = vadd.f32 %v1639_v36, %v1020_v34  ;;  %v1641_v40 = vpop.f32.mrb[17].mxu0 }
 0x2d3   : > { %v1695_v43 = vadd.f32 %v1641_v40, %v1021_v35  ;;  %v1643_v44 = vpop.f32.mrb[18].mxu0 }
 0x2d4   : > { %1726 = vst [vmem:[#allocation2 + $0x80] sm:$0xff] %v1694_v38  ;;  %v1696_v45 = vadd.f32 %v1643_v44, %v1022_v37  ;;  %v1645_v46 = vpop.f32.mrb[19].mxu0 }
 0x2d5   : > { %1727 = vst [vmem:[#allocation2 + $0x88] sm:$0xff] %v1695_v43  ;;  %v1697_v48 = vadd.f32 %v1645_v46, %v1023_v41 }
 0x2d6   : > { %1728 = vst [vmem:[#allocation2 + $0x90] sm:$0xff] %v1696_v45 }
 0x2d7   : > { %1729 = vst [vmem:[#allocation2 + $0x98] sm:$0xff] %v1697_v48 }
 0x2d9   : > { %v1649_v51 = vpop.f32.mrb[20].mxu0 }
 0x2da   : > { %v1698_v14 = vadd.f32 %v1649_v51, %v1024_v49  ;;  %v1651_v39 = vpop.f32.mrb[21].mxu0 }
 0x2db   : > { %v1699_v47 = vadd.f32 %v1651_v39, %v1025_v50  ;;  %v1653_v53 = vpop.f32.mrb[22].mxu0 }
 0x2dc   : > { %1730 = vst [vmem:[#allocation2 + $0xa0] sm:$0xff] %v1698_v14  ;;  %v1700_v54 = vadd.f32 %v1653_v53, %v1026_v52  ;;  %v1655_v55 = vpop.f32.mrb[23].mxu0 }
 0x2dd   : > { %1731 = vst [vmem:[#allocation2 + $0xa8] sm:$0xff] %v1699_v47  ;;  %v1701_v56 = vadd.f32 %v1655_v55, %v1027_v42 }
 0x2de   : > { %1732 = vst [vmem:[#allocation2 + $0xb0] sm:$0xff] %v1700_v54 }
 0x2df   : > { %1733 = vst [vmem:[#allocation2 + $0xb8] sm:$0xff] %v1701_v56 }
 0x2e1   : > { %v1659_v59 = vpop.f32.mrb[24].mxu0 }
 0x2e2   : > { %v1702_v61 = vadd.f32 %v1659_v59, %v1028_v57  ;;  %v1661_v62 = vpop.f32.mrb[25].mxu0 }
 0x2e3   : > { %v1703_v0 = vadd.f32 %v1661_v62, %v1029_v58  ;;  %v1663_v1 = vpop.f32.mrb[26].mxu0 }
 0x2e4   : > { %1734 = vst [vmem:[#allocation2 + $0xc0] sm:$0xff] %v1702_v61  ;;  %v1704_v2 = vadd.f32 %v1663_v1, %v1030_v60  ;;  %v1665_v3 = vpop.f32.mrb[27].mxu0 }
 0x2e5   : > { %1735 = vst [vmem:[#allocation2 + $0xc8] sm:$0xff] %v1703_v0  ;;  %v1705_v4 = vadd.f32 %v1665_v3, %v1031_v63 }
 0x2e6   : > { %1736 = vst [vmem:[#allocation2 + $0xd0] sm:$0xff] %v1704_v2 }
 0x2e7   : > { %1737 = vst [vmem:[#allocation2 + $0xd8] sm:$0xff] %v1705_v4 }
 0x2e9   : > { %v1669_v7 = vpop.f32.mrb[28].mxu0 }
 0x2ea   : > { %v1706_v9 = vadd.f32 %v1669_v7, %v1032_v5  ;;  %v1671_v10 = vpop.f32.mrb[29].mxu0 }
 0x2eb   : > { %v1707_v12 = vadd.f32 %v1671_v10, %v1033_v6  ;;  %v1673_v13 = vpop.f32.mrb[30].mxu0 }
 0x2ec   : > { %1738 = vst [vmem:[#allocation2 + $0xe0] sm:$0xff] %v1706_v9  ;;  %v1708_v15 = vadd.f32 %v1673_v13, %v1034_v8  ;;  %v1675_v16 = vpop.f32.mrb[31].mxu0 }
 0x2ed   : > { %1739 = vst [vmem:[#allocation2 + $0xe8] sm:$0xff] %v1707_v12  ;;  %v1709_v17 = vadd.f32 %v1675_v16, %v1035_v11 }
 0x2ee   : > { %1740 = vst [vmem:[#allocation2 + $0xf0] sm:$0xff] %v1708_v15 }
 0x2ef   : > { %1741 = vst [vmem:[#allocation2 + $0xf8] sm:$0xff] %v1709_v17 }
 0x2f0 PF: > { %v1745_v18 = vld [vmem:[#allocation2] sm:$0xff]  ;;  %v1746_v19 = vld [vmem:[#allocation2 + $0x8] sm:$0xff]  ;;  %v1747_v20 = vld [vmem:[#allocation2 + $0x10] sm:$0xff]  ;;  %s2209_s8 = sshll.u32 %s2725_s28, 11  ;;  %s1904_s22 = sshll.u32 %s2991_s6, 4  ;;  %s3077_s22 = int_to_ptr.vmem [resolvable:$true] %s1904_s22 }
 0x2f1   : > { %v2192_v21 = vpack.c.bf16 %v1746_v19, %v1745_v18  ;;  %v1748_v22 = vld [vmem:[#allocation2 + $0x18] sm:$0xff]  ;;  %v1749_v23 = vld [vmem:[#allocation2 + $0x20] sm:$0xff]  ;;  %v1750_v24 = vld [vmem:[#allocation2 + $0x28] sm:$0xff]  ;;  %s3075_s21 = scalar_lea.hbm %s3133_s4, %s2209_s8  ;;  %s1890_s12 = scalar_lea.sflag [#allocation7], %s2970_s11 }
 0x2f2   : > { %v2193_v25 = vpack.c.bf16 %v1748_v22, %v1747_v20  ;;  %v2194_v26 = vpack.c.bf16 %v1750_v24, %v1749_v23  ;;  %v1751_v27 = vld [vmem:[#allocation2 + $0x30] sm:$0xff]  ;;  %v1752_v28 = vld [vmem:[#allocation2 + $0x38] sm:$0xff]  ;;  %v1753_v29 = vld [vmem:[#allocation2 + $0x40] sm:$0xff]  ;;  %s2645_s0 = scalar_lea.vmem %s3077_s22, 2048  ;;  %s2744_s20 = smov [#allocation11]  }
 0x2f3   : > { %1873 = vst [vmem:[%s2991_s6] sm:$0xff] %v2192_v21  ;;  %v2195_v30 = vpack.c.bf16 %v1752_v28, %v1751_v27  ;;  %v1754_v31 = vld [vmem:[#allocation2 + $0x48] sm:$0xff]  ;;  %v1755_v32 = vld [vmem:[#allocation2 + $0x50] sm:$0xff]  ;;  %v1756_v33 = vld [vmem:[#allocation2 + $0x58] sm:$0xff]  ;;  %p2646_p5 = scmp.ne.s32.totalorder %s3077_s22, %s2645_s0  ;;  %s2649_s16 = sshll.u32 %s2744_s20, 4  ;;  %s2650_s16 = int_to_ptr.vmem [resolvable:$false] %s2649_s16 }
 0x2f4   : > { %1874 = vst [vmem:[%s2991_s6 + $0x8] sm:$0xff] %v2193_v25  ;;  %1875 = vst [vmem:[%s2991_s6 + $0x10] sm:$0xff] %v2194_v26  ;;  %v2196_v34 = vpack.c.bf16 %v1754_v31, %v1753_v29  ;;  %v2197_v35 = vpack.c.bf16 %v1756_v33, %v1755_v32  ;;  %v1757_v36 = vld [vmem:[#allocation2 + $0x60] sm:$0xff]  ;;  %v1758_v37 = vld [vmem:[#allocation2 + $0x68] sm:$0xff]  ;;  %s2651_s7 = scalar_lea.vmem %s2650_s16, 4096  ;;  %p2652_p2 = scmp.lt.s32.totalorder %s3077_s22, %s2650_s16 }
 0x2f5   : > { %v1759_v38 = vld [vmem:[#allocation2 + $0x70] sm:$0xff]  ;;  %1876 = vst [vmem:[%s2991_s6 + $0x18] sm:$0xff] %v2195_v30  ;;  %v2198_v40 = vpack.c.bf16 %v1758_v37, %v1757_v36  ;;  %v1760_v41 = vld [vmem:[#allocation2 + $0x78] sm:$0xff]  ;;  %v1761_v43 = vld [vmem:[#allocation2 + $0x80] sm:$0xff]  ;;  %p2647_p7 = pnand %p2646_p5, %p2912_p11  ;;  %p2653_p3 = scmp.lt.s32.totalorder %s2651_s7, %s2645_s0 }
 0x2f6   : > { %v1762_v44 = vld [vmem:[#allocation2 + $0x88] sm:$0xff]  ;;  %1877 = vst [vmem:[%s2991_s6 + $0x20] sm:$0xff] %v2196_v34  ;;  %1878 = vst [vmem:[%s2991_s6 + $0x28] sm:$0xff] %v2197_v35  ;;  %v2199_v45 = vpack.c.bf16 %v1760_v41, %v1759_v38  ;;  %v1763_v48 = vld [vmem:[#allocation2 + $0x90] sm:$0xff] }
 0x2f7   : > { %v2200_v46 = vpack.c.bf16 %v1762_v44, %v1761_v43  ;;  %v1764_v49 = vld [vmem:[#allocation2 + $0x98] sm:$0xff]  ;;  %v1765_v50 = vld [vmem:[#allocation2 + $0xa0] sm:$0xff]  ;;  %1879 = vst [vmem:[%s2991_s6 + $0x30] sm:$0xff] %v2198_v40  ;;  %v1766_v52 = vld [vmem:[#allocation2 + $0xa8] sm:$0xff]  ;;  %p2648_p9 = pneg %p2647_p7  ;;  %p2654_p8 = por %p2653_p3, %p2652_p2 }
 0x2f8   : > { %v2201_v51 = vpack.c.bf16 %v1764_v49, %v1763_v48  ;;  %v1767_v14 = vld [vmem:[#allocation2 + $0xb0] sm:$0xff]  ;;  %v1768_v39 = vld [vmem:[#allocation2 + $0xb8] sm:$0xff]  ;;  %1880 = vst [vmem:[%s2991_s6 + $0x38] sm:$0xff] %v2199_v45  ;;  %v2202_v42 = vpack.c.bf16 %v1766_v52, %v1765_v50  ;;  %v1769_v53 = vld [vmem:[#allocation2 + $0xc0] sm:$0xff] }
 0x2f9   : > { %1881 = vst [vmem:[%s2991_s6 + $0x40] sm:$0xff] %v2200_v46  ;;  %v2203_v47 = vpack.c.bf16 %v1768_v39, %v1767_v14  ;;  %v1770_v54 = vld [vmem:[#allocation2 + $0xc8] sm:$0xff]  ;;  %v1771_v55 = vld [vmem:[#allocation2 + $0xd0] sm:$0xff]  ;;  %v1772_v57 = vld [vmem:[#allocation2 + $0xd8] sm:$0xff]  ;;  %p2655_p12 = pnand %p2654_p8, %p2648_p9 }
 0x2fa   : > { %1882 = vst [vmem:[%s2991_s6 + $0x48] sm:$0xff] %v2201_v51  ;;  %v2204_v56 = vpack.c.bf16 %v1770_v54, %v1769_v53  ;;  %v1773_v58 = vld [vmem:[#allocation2 + $0xe0] sm:$0xff]  ;;  %v1774_v59 = vld [vmem:[#allocation2 + $0xe8] sm:$0xff]  ;;  %1883 = vst [vmem:[%s2991_s6 + $0x50] sm:$0xff] %v2202_v42  ;;  %v2205_v60 = vpack.c.bf16 %v1772_v57, %v1771_v55 }
 0x2fb   : > { %1884 = vst [vmem:[%s2991_s6 + $0x58] sm:$0xff] %v2203_v47  ;;  %v2206_v61 = vpack.c.bf16 %v1774_v59, %v1773_v58  ;;  %v1775_v62 = vld [vmem:[#allocation2 + $0xf0] sm:$0xff]  ;;  %v1776_v63 = vld [vmem:[#allocation2 + $0xf8] sm:$0xff] }
 0x2fc   : > { %1885 = vst [vmem:[%s2991_s6 + $0x60] sm:$0xff] %v2204_v56  ;;  %v2207_v0 = vpack.c.bf16 %v1776_v63, %v1775_v62  ;;  %1886 = vst [vmem:[%s2991_s6 + $0x68] sm:$0xff] %v2205_v60 }
 0x2fd   : > { %1887 = vst [vmem:[%s2991_s6 + $0x70] sm:$0xff] %v2206_v61 }
 0x2fe   : > { %1888 = vst [vmem:[%s2991_s6 + $0x78] sm:$0xff] %v2207_v0 }
 0x2ff   : > { %2658 = shalt.err (!%p2655_p12)
}
 0x300   : > { %s2659_s14 = scalar_lea.hbm %s3075_s21, 2048  ;;  %s2663_s19 = scalar_lea.hbm %s3133_s4, 8192 }
 0x301   : > { %p2660_p1 = scmp.ne.s32.totalorder %s3075_s21, %s2659_s14  ;;  %p2664_p10 = scmp.lt.u32.totalorder %s3075_s21, %s3133_s4 }
 0x302   : > { %p2665_p13 = scmp.lt.u32.totalorder %s2663_s19, %s2659_s14  ;;  %p2667_p5 = scmp.lt.u32.totalorder %s2659_s14, %s3075_s21 }
 0x303   : > { %p2661_p0 = pnand %p2660_p1, %p2912_p11 }
 0x304   : > { %p2666_p4 = por %p2665_p13, %p2664_p10 }
 0x305   : > { %p2662_p6 = pneg %p2661_p0 }
 0x306   : > { %p2668_p7 = por %p2667_p5, %p2666_p4 }
 0x308   : > { %p2669_p9 = pnand %p2668_p7, %p2662_p6 }
 0x30a   : > { %2672 = shalt.err (!%p2669_p9)
}
 0x30b   : > { %s2745_s6 = smov 128   ;;  %s2746_s8 = smov 8  }
 0x30c   : > { %2252 = dma.vmem_to_hbm [thread:$0]  (%p2912_p11), %s3077_s22, 2048, %s3075_s21, %s1890_s12, %s2745_s6, %s2745_s6, %s2746_s8  }
 0x30d PF: > { %p2274_p2 = scmp.ge.s32.totalorder %s2733_s30, 2  ;;  %s1919_s28 = sand.u32 1, %s2713_s25  }
 0x30e   : > { %p3150_p3 = scmp.ne.s32.totalorder %s3141_s9, 0  ;;  %s1920_s23 = scalar_lea.sflag [#allocation7], %s1919_s28 }
 0x310   : > { %p2266_p8 = pnand %p2274_p2, %p3150_p3 }
 0x312   : > { %2708 = dma.done.wait (!%p2266_p8), %s1920_s23, 2048  }
 0x313   : > { %2710 = vsyncadd (!%p2266_p8), %s1920_s23, 4294965248  ;;  %s25_s30 = sadd.s32 1, %s2733_s30   ;;  %s3151_s25 = smov %s2717_s26 }
 0x314   : > { %p22_p12 = scmp.ge.s32.totalorder %s25_s30, 6   ;;  %s3152_s26 = smov %s2721_s27 }
 0x315   : > { %s3153_s27 = smov %s2921_s18  ;;  %s3154_s28 = smov %s2729_s29 }
 0x316   : > { %s3155_s29 = smov %s3157_s5  ;;  %24 = sbr.rel (!%p22_p12) target bundleno = 19 (0x13), region = 99 }
 0x31d   :  { %1925 = vsyncpa [#allocation6], 1 }
 0x31e   :  { %1927 = vsyncpa [#allocation6 + $0x1], 1 }
 0x31f   :  { %1928 = vsyncpa [#allocation9], 1 }
 0x320   :  { %1929 = vsyncpa [#allocation7], 1 }
 0x321   :  { %1931 = vsyncpa [#allocation7 + $0x1], 1 }

</bundles_post_ra>
